<compile_context>
chip_gen: v7x
topology: tpu7x:2x2x1
jax: 0.10.0
libtpu: 0.0.40
codegen_flags: <defaults>
</compile_context>

<pallas_src>
import math
from functools import partial

import jax
import jax.numpy as jnp
from jax.experimental import pallas as pl
from jax.experimental.pallas import tpu as pltpu


def _round_up(x, m):
    return (x + m - 1) // m * m


def _cross_attn_kernel(xq_ref, xkv_ref, wq_ref, wk_ref, wv_ref, wo_ref, bo_ref,
                       mask_ref, bias_ref, out_ref, *,
                       num_heads, c_hidden, inf, scale):
    # Ref shapes (leading batch / q-tile dims squeezed by the BlockSpecs):
    #   xq_ref   [tq, c_q]      query activations for this (batch, q-tile)
    #   xkv_ref  [KV, c_kv]     key/value activations for this batch
    #   wq_ref   [c_q,  H*Dh]   full projection weights (resident in VMEM)
    #   wk_ref   [c_kv, H*Dh]
    #   wv_ref   [c_kv, H*Dh]
    #   wo_ref   [H*Dh, Cpad]   output projection, lane-padded to a 128 multiple
    #   bo_ref   [1, Cpad]
    #   mask_ref [1, KV]        compact mask row (broadcast over heads & queries)
    #   bias_ref [H, tq, KV]    logit bias, natural per-head layout
    #   out_ref  [tq, Cpad]
    xq = xq_ref[...]
    xkv = xkv_ref[...]

    # Head-fused projections: one wide matmul each for Q, K, V.
    q = jnp.dot(xq, wq_ref[...], preferred_element_type=jnp.float32)    # [tq, H*Dh]
    k = jnp.dot(xkv, wk_ref[...], preferred_element_type=jnp.float32)   # [KV, H*Dh]
    v = jnp.dot(xkv, wv_ref[...], preferred_element_type=jnp.float32)   # [KV, H*Dh]
    q = q * scale

    # Additive mask row computed once from the compact mask (not per head).
    neg_mask = (mask_ref[...].astype(jnp.float32) - 1.0) * inf           # [1, KV]

    # Small static (unrolled) head loop for the [tq, KV] score / context matmuls.
    ctx = []
    for h in range(num_heads):
        lo = h * c_hidden
        qh = q[:, lo:lo + c_hidden]                                      # [tq, Dh]
        kh = k[:, lo:lo + c_hidden]                                      # [KV, Dh]
        vh = v[:, lo:lo + c_hidden]                                      # [KV, Dh]

        logits = jax.lax.dot_general(qh, kh, (((1,), (1,)), ((), ())),
                                     preferred_element_type=jnp.float32)  # [tq, KV]
        logits = logits + neg_mask + bias_ref[h].astype(jnp.float32)

        m = jnp.max(logits, axis=-1, keepdims=True)
        p = jnp.exp(logits - m)
        denom = jnp.sum(p, axis=-1, keepdims=True)
        attn = p * pl.reciprocal(denom, approx=True)                     # EUP, not VPU divide

        ctx.append(jnp.dot(attn, vh, preferred_element_type=jnp.float32))

    o = jnp.concatenate(ctx, axis=-1)                                    # [tq, H*Dh]

    # Single fused output projection over all heads; lane-dense (Cpad) store.
    out = jnp.dot(o, wo_ref[...], preferred_element_type=jnp.float32) + bo_ref[...]
    out_ref[...] = out.astype(out_ref.dtype)


def cross_attention_no_gate(input_q, input_kv, mask, bias, params, *,
                            num_heads, c_hidden, inf, block_q=128):
    """Forward pass of CrossAttentionNoGate (impl='torch', chunk_size=None)."""
    B, Q, c_q = input_q.shape
    Bkv, KV, c_kv = input_kv.shape
    assert Bkv == B
    H, Dh = num_heads, c_hidden
    HD = H * Dh

    wq, wk, wv, wo, bo = (params[k] for k in ("wq", "wk", "wv", "wo", "bo"))

    # torch Linear stores [out, in]; transpose once so the kernel computes x @ W.
    wq_t = wq.T                                    # [c_q,  HD]
    wk_t = wk.T                                    # [c_kv, HD]
    wv_t = wv.T                                    # [c_kv, HD]

    # Lane-dense output: pad output channels to a multiple of 128 so the final
    # store is an unmasked full-lane vst; the pad columns are exact zeros.
    c_pad = _round_up(c_q, 128)
    wo_pad = jnp.zeros((HD, c_pad), wo.dtype).at[:, :c_q].set(wo.T)
    bo_pad = jnp.zeros((1, c_pad), bo.dtype).at[:, :c_q].set(bo.reshape(1, c_q))

    # Compact mask: keep only [B, 1, KV] in HBM (no [B,H,Q,KV] materialization).
    mask = jnp.asarray(mask)
    if mask.ndim < 4:
        mask = mask.reshape((1,) * (4 - mask.ndim) + mask.shape)
    assert mask.shape[-3] == 1 and mask.shape[-2] == 1, \
        "per-head/per-query masks not supported; fold them into `bias`"  # TODO(synk): general masks
    mask_c = jnp.broadcast_to(mask.astype(jnp.float32),
                              (B, 1, 1, KV)).reshape(B, 1, KV)

    # Bias in its natural [B, H, Q, KV] layout (no-op for a full-shape bias).
    if bias is None:
        bias = jnp.zeros((1, 1, 1, 1), dtype=input_q.dtype)
    bias_f = jnp.broadcast_to(bias, (B, H, Q, KV))

    # Query tiling keeps the O(S^2) bias block bounded for large Q.
    tq = Q if Q <= block_q else block_q
    assert Q % tq == 0, "ragged query tiling not implemented"  # TODO(synk): pad/mask ragged Q
    n_qt = Q // tq

    scale = 1.0 / math.sqrt(Dh)
    kernel = partial(_cross_attn_kernel, num_heads=H, c_hidden=Dh,
                     inf=float(inf), scale=scale)

    grid_spec = pltpu.PrefetchScalarGridSpec(
        num_scalar_prefetch=0,
        grid=(B, n_qt),
        in_specs=[
            pl.BlockSpec((None, tq, c_q), lambda b, t: (b, t, 0)),        # input_q tile
            pl.BlockSpec((None, KV, c_kv), lambda b, t: (b, 0, 0)),       # input_kv (per batch)
            pl.BlockSpec((c_q, HD), lambda b, t: (0, 0)),                 # Wq  (resident)
            pl.BlockSpec((c_kv, HD), lambda b, t: (0, 0)),                # Wk  (resident)
            pl.BlockSpec((c_kv, HD), lambda b, t: (0, 0)),                # Wv  (resident)
            pl.BlockSpec((HD, c_pad), lambda b, t: (0, 0)),               # Wo  (resident)
            pl.BlockSpec((1, c_pad), lambda b, t: (0, 0)),                # bo  (resident)
            pl.BlockSpec((None, 1, KV), lambda b, t: (b, 0, 0)),          # compact mask row
            pl.BlockSpec((None, H, tq, KV), lambda b, t: (b, 0, t, 0)),   # bias tile
        ],
        out_specs=pl.BlockSpec((None, tq, c_pad), lambda b, t: (b, t, 0)),
    )

    # Explicit VMEM budget (double-buffered pipelined blocks + resident weights).
    blk_bytes = 4 * (2 * (tq * c_q + KV * c_kv + KV + H * tq * KV + tq * c_pad)
                     + (c_q + 2 * c_kv) * HD + HD * c_pad + c_pad)
    vmem_limit = int(min(max(2 * blk_bytes, 32 * 1024 * 1024), 64 * 1024 * 1024))

    out_padded = pl.pallas_call(
        kernel,
        out_shape=jax.ShapeDtypeStruct((B, Q, c_pad), input_q.dtype),
        grid_spec=grid_spec,
        compiler_params=pltpu.CompilerParams(
            dimension_semantics=("parallel", "parallel"),
            vmem_limit_bytes=vmem_limit),
    )(input_q, input_kv, wq_t, wk_t, wv_t, wo_pad, bo_pad, mask_c, bias_f)

    return out_padded[..., :c_q]


def reference(input_q, input_kv, mask, bias, params, *, num_heads, c_hidden, inf):
    """Pure-JAX mirror of the torch forward (impl='torch', chunk_size=None)."""
    B, Q, _ = input_q.shape
    _, KV, _ = input_kv.shape
    H, Dh = num_heads, c_hidden
    wq, wk, wv, wo, bo = (params[k] for k in ("wq", "wk", "wv", "wo", "bo"))

    q = (input_q @ wq.T).reshape(B, Q, H, Dh).transpose(0, 2, 1, 3)     # [B,H,Q,Dh]
    k = (input_kv @ wk.T).reshape(B, KV, H, Dh).transpose(0, 2, 1, 3)
    v = (input_kv @ wv.T).reshape(B, KV, H, Dh).transpose(0, 2, 1, 3)

    scale = 1.0 / math.sqrt(Dh)
    a = jnp.einsum("bhqd,bhkd->bhqk", q * scale, k)
    a = a + (jnp.broadcast_to(mask, (B, H, Q, KV)) - 1.0) * inf
    if bias is not None:
        a = a + jnp.broadcast_to(bias, (B, H, Q, KV))
    a = jax.nn.softmax(a, axis=-1)
    o = jnp.einsum("bhqk,bhkd->bhqd", a, v)
    o = o.transpose(0, 2, 1, 3).reshape(B, Q, H * Dh)
    return o @ wo.T + bo


if __name__ == "__main__":
    B, Q, KV = 2, 16, 24
    c_q, c_kv = 32, 48
    c_hidden, num_heads = 16, 4
    inf = 1e9
    HD = c_hidden * num_heads

    key = jax.random.PRNGKey(0)
    ks = jax.random.split(key, 10)

    input_q = jax.random.normal(ks[0], (B, Q, c_q), dtype=jnp.float32)
    input_kv = jax.random.normal(ks[1], (B, KV, c_kv), dtype=jnp.float32)

    params = {
        "wq": 0.1 * jax.random.normal(ks[2], (HD, c_q), dtype=jnp.float32),
        "wk": 0.1 * jax.random.normal(ks[3], (HD, c_kv), dtype=jnp.float32),
        "wv": 0.1 * jax.random.normal(ks[4], (HD, c_kv), dtype=jnp.float32),
        "wo": 0.1 * jax.random.normal(ks[5], (c_q, HD), dtype=jnp.float32),
        "bo": 0.1 * jax.random.normal(ks[6], (c_q,), dtype=jnp.float32),
    }

    # mask broadcastable to [B, H, Q, KV]: per-batch key mask, always keep key 0
    mask = (jax.random.uniform(ks[7], (B, 1, 1, KV)) > 0.2).astype(jnp.float32)
    mask = mask.at[..., 0].set(1.0)
    # bias broadcastable to [B, H, Q, KV]
    bias = 0.1 * jax.random.normal(ks[8], (B, num_heads, Q, KV), dtype=jnp.float32)

    out = cross_attention_no_gate(input_q, input_kv, mask, bias, params,
                                  num_heads=num_heads, c_hidden=c_hidden, inf=inf)
    out = jax.block_until_ready(out)

    ref = reference(input_q, input_kv, mask, bias, params,
                    num_heads=num_heads, c_hidden=c_hidden, inf=inf)
    assert out.shape == (B, Q, c_q)
    err = jnp.max(jnp.abs(out - ref))
    assert jnp.allclose(out, ref, rtol=2e-3, atol=2e-3), f"max abs err {err}"

    print("KERNEL_OK")
</pallas_src>

<mosaic_0001>
module attributes {stable_mosaic.version = 11 : i64} {
  func.func @_cross_attn_kernel(%arg0: i32, %arg1: i32, %arg2: memref<1x16x32xf32, #tpu.memory_space<vmem>>, %arg3: memref<1x24x48xf32, #tpu.memory_space<vmem>>, %arg4: memref<32x64xf32, #tpu.memory_space<vmem>>, %arg5: memref<48x64xf32, #tpu.memory_space<vmem>>, %arg6: memref<48x64xf32, #tpu.memory_space<vmem>>, %arg7: memref<64x128xf32, #tpu.memory_space<vmem>>, %arg8: memref<1x128xf32, #tpu.memory_space<vmem>>, %arg9: memref<1x1x24xf32, #tpu.memory_space<vmem>>, %arg10: memref<1x4x16x24xf32, #tpu.memory_space<vmem>>, %arg11: memref<1x16x128xf32, #tpu.memory_space<vmem>>) attributes {dimension_semantics = [#tpu.dimension_semantics<parallel>, #tpu.dimension_semantics<parallel>], iteration_bounds = array<i64: 2, 1>, scalar_prefetch = 0 : i64, scratch_operands = 0 : i64, tpu.core_type = #tpu.core_type<tc>, window_params = [{transform_indices = @transform_0, window_bounds = array<i64: 1, 16, 32>}, {transform_indices = @transform_1, window_bounds = array<i64: 1, 24, 48>}, {pipeline_mode = #tpu.pipeline_mode<synchronous>, transform_indices = @transform_2, window_bounds = array<i64: 32, 64>}, {pipeline_mode = #tpu.pipeline_mode<synchronous>, transform_indices = @transform_3, window_bounds = array<i64: 48, 64>}, {pipeline_mode = #tpu.pipeline_mode<synchronous>, transform_indices = @transform_4, window_bounds = array<i64: 48, 64>}, {pipeline_mode = #tpu.pipeline_mode<synchronous>, transform_indices = @transform_5, window_bounds = array<i64: 64, 128>}, {pipeline_mode = #tpu.pipeline_mode<synchronous>, transform_indices = @transform_6, window_bounds = array<i64: 1, 128>}, {transform_indices = @transform_7, window_bounds = array<i64: 1, 1, 24>}, {transform_indices = @transform_8, window_bounds = array<i64: 1, 4, 16, 24>}, {transform_indices = @transform_9, window_bounds = array<i64: 1, 16, 128>}]} {
    %c0 = arith.constant 0 : index
    %c0_0 = arith.constant 0 : index
    %c0_1 = arith.constant 0 : index
    %0 = vector.load %arg2[%c0, %c0_0, %c0_1] : memref<1x16x32xf32, #tpu.memory_space<vmem>>, vector<1x16x32xf32>
    %1 = vector.shape_cast %0 : vector<1x16x32xf32> to vector<16x32xf32>
    %c0_2 = arith.constant 0 : index
    %c0_3 = arith.constant 0 : index
    %c0_4 = arith.constant 0 : index
    %2 = vector.load %arg3[%c0_2, %c0_3, %c0_4] : memref<1x24x48xf32, #tpu.memory_space<vmem>>, vector<1x24x48xf32>
    %3 = vector.shape_cast %2 : vector<1x24x48xf32> to vector<24x48xf32>
    %c0_5 = arith.constant 0 : index
    %c0_6 = arith.constant 0 : index
    %4 = vector.load %arg4[%c0_5, %c0_6] : memref<32x64xf32, #tpu.memory_space<vmem>>, vector<32x64xf32>
    %cst = arith.constant dense<0.000000e+00> : vector<16x64xf32>
    %5 = tpu.matmul %1, %4, %cst {dimension_numbers = #tpu.dot_dimension_numbers<[1], [0], [0], [1], [0, 0, 1, 1], [], []>} : vector<16x32xf32>, vector<32x64xf32>, vector<16x64xf32> -> vector<16x64xf32>
    %c0_7 = arith.constant 0 : index
    %c0_8 = arith.constant 0 : index
    %6 = vector.load %arg5[%c0_7, %c0_8] : memref<48x64xf32, #tpu.memory_space<vmem>>, vector<48x64xf32>
    %cst_9 = arith.constant dense<0.000000e+00> : vector<24x64xf32>
    %7 = tpu.matmul %3, %6, %cst_9 {dimension_numbers = #tpu.dot_dimension_numbers<[1], [0], [0], [1], [0, 0, 1, 1], [], []>} : vector<24x48xf32>, vector<48x64xf32>, vector<24x64xf32> -> vector<24x64xf32>
    %c0_10 = arith.constant 0 : index
    %c0_11 = arith.constant 0 : index
    %8 = vector.load %arg6[%c0_10, %c0_11] : memref<48x64xf32, #tpu.memory_space<vmem>>, vector<48x64xf32>
    %cst_12 = arith.constant dense<0.000000e+00> : vector<24x64xf32>
    %9 = tpu.matmul %3, %8, %cst_12 {dimension_numbers = #tpu.dot_dimension_numbers<[1], [0], [0], [1], [0, 0, 1, 1], [], []>} : vector<24x48xf32>, vector<48x64xf32>, vector<24x64xf32> -> vector<24x64xf32>
    %cst_13 = arith.constant 2.500000e-01 : f32
    %10 = vector.broadcast %cst_13 : f32 to vector<16x64xf32>
    %11 = arith.mulf %5, %10 : vector<16x64xf32>
    %c0_14 = arith.constant 0 : index
    %c0_15 = arith.constant 0 : index
    %c0_16 = arith.constant 0 : index
    %12 = vector.load %arg9[%c0_14, %c0_15, %c0_16] : memref<1x1x24xf32, #tpu.memory_space<vmem>>, vector<1x1x24xf32>
    %13 = vector.shape_cast %12 : vector<1x1x24xf32> to vector<1x24xf32>
    %cst_17 = arith.constant 1.000000e+00 : f32
    %14 = vector.broadcast %cst_17 : f32 to vector<1x24xf32>
    %15 = arith.subf %13, %14 : vector<1x24xf32>
    %cst_18 = arith.constant 1.000000e+09 : f32
    %16 = vector.broadcast %cst_18 : f32 to vector<1x24xf32>
    %17 = arith.mulf %15, %16 : vector<1x24xf32>
    %18 = vector.extract_strided_slice %11 {offsets = [0, 0], sizes = [16, 16], strides = [1, 1]} : vector<16x64xf32> to vector<16x16xf32>
    %19 = vector.extract_strided_slice %7 {offsets = [0, 0], sizes = [24, 16], strides = [1, 1]} : vector<24x64xf32> to vector<24x16xf32>
    %20 = vector.extract_strided_slice %9 {offsets = [0, 0], sizes = [24, 16], strides = [1, 1]} : vector<24x64xf32> to vector<24x16xf32>
    %cst_19 = arith.constant dense<0.000000e+00> : vector<16x24xf32>
    %21 = tpu.matmul %18, %19, %cst_19 {dimension_numbers = #tpu.dot_dimension_numbers<[1], [1], [0], [0], [0, 0, 1, 0], [], []>} : vector<16x16xf32>, vector<24x16xf32>, vector<16x24xf32> -> vector<16x24xf32>
    %22 = vector.broadcast %17 : vector<1x24xf32> to vector<16x24xf32>
    %23 = arith.addf %21, %22 : vector<16x24xf32>
    %c0_20 = arith.constant 0 : index
    %c0_21 = arith.constant 0 : index
    %c0_22 = arith.constant 0 : index
    %c0_23 = arith.constant 0 : index
    %24 = vector.load %arg10[%c0_20, %c0_21, %c0_22, %c0_23] : memref<1x4x16x24xf32, #tpu.memory_space<vmem>>, vector<1x1x16x24xf32>
    %25 = vector.shape_cast %24 : vector<1x1x16x24xf32> to vector<16x24xf32>
    %26 = arith.addf %23, %25 : vector<16x24xf32>
    %cst_24 = arith.constant dense<0xFF800000> : vector<16xf32>
    %27 = vector.multi_reduction <maximumf>, %26, %cst_24 [1] : vector<16x24xf32> to vector<16xf32>
    %28 = vector.shape_cast %27 : vector<16xf32> to vector<16x1xf32>
    %29 = vector.broadcast %28 : vector<16x1xf32> to vector<16x24xf32>
    %30 = arith.subf %26, %29 : vector<16x24xf32>
    %31 = math.exp %30 : vector<16x24xf32>
    %cst_25 = arith.constant dense<0.000000e+00> : vector<16xf32>
    %32 = vector.multi_reduction <add>, %31, %cst_25 [1] : vector<16x24xf32> to vector<16xf32>
    %33 = vector.shape_cast %32 : vector<16xf32> to vector<16x1xf32>
    %34 = tpu.reciprocal %33 {approx = true} : vector<16x1xf32> -> vector<16x1xf32>
    %35 = vector.broadcast %34 : vector<16x1xf32> to vector<16x24xf32>
    %36 = arith.mulf %31, %35 : vector<16x24xf32>
    %cst_26 = arith.constant dense<0.000000e+00> : vector<16x16xf32>
    %37 = tpu.matmul %36, %20, %cst_26 {dimension_numbers = #tpu.dot_dimension_numbers<[1], [0], [0], [1], [0, 0, 1, 1], [], []>} : vector<16x24xf32>, vector<24x16xf32>, vector<16x16xf32> -> vector<16x16xf32>
    %38 = vector.extract_strided_slice %11 {offsets = [0, 16], sizes = [16, 16], strides = [1, 1]} : vector<16x64xf32> to vector<16x16xf32>
    %39 = vector.extract_strided_slice %7 {offsets = [0, 16], sizes = [24, 16], strides = [1, 1]} : vector<24x64xf32> to vector<24x16xf32>
    %40 = vector.extract_strided_slice %9 {offsets = [0, 16], sizes = [24, 16], strides = [1, 1]} : vector<24x64xf32> to vector<24x16xf32>
    %cst_27 = arith.constant dense<0.000000e+00> : vector<16x24xf32>
    %41 = tpu.matmul %38, %39, %cst_27 {dimension_numbers = #tpu.dot_dimension_numbers<[1], [1], [0], [0], [0, 0, 1, 0], [], []>} : vector<16x16xf32>, vector<24x16xf32>, vector<16x24xf32> -> vector<16x24xf32>
    %42 = vector.broadcast %17 : vector<1x24xf32> to vector<16x24xf32>
    %43 = arith.addf %41, %42 : vector<16x24xf32>
    %c0_28 = arith.constant 0 : index
    %c1 = arith.constant 1 : index
    %c0_29 = arith.constant 0 : index
    %c0_30 = arith.constant 0 : index
    %44 = vector.load %arg10[%c0_28, %c1, %c0_29, %c0_30] : memref<1x4x16x24xf32, #tpu.memory_space<vmem>>, vector<1x1x16x24xf32>
    %45 = vector.shape_cast %44 : vector<1x1x16x24xf32> to vector<16x24xf32>
    %46 = arith.addf %43, %45 : vector<16x24xf32>
    %cst_31 = arith.constant dense<0xFF800000> : vector<16xf32>
    %47 = vector.multi_reduction <maximumf>, %46, %cst_31 [1] : vector<16x24xf32> to vector<16xf32>
    %48 = vector.shape_cast %47 : vector<16xf32> to vector<16x1xf32>
    %49 = vector.broadcast %48 : vector<16x1xf32> to vector<16x24xf32>
    %50 = arith.subf %46, %49 : vector<16x24xf32>
    %51 = math.exp %50 : vector<16x24xf32>
    %cst_32 = arith.constant dense<0.000000e+00> : vector<16xf32>
    %52 = vector.multi_reduction <add>, %51, %cst_32 [1] : vector<16x24xf32> to vector<16xf32>
    %53 = vector.shape_cast %52 : vector<16xf32> to vector<16x1xf32>
    %54 = tpu.reciprocal %53 {approx = true} : vector<16x1xf32> -> vector<16x1xf32>
    %55 = vector.broadcast %54 : vector<16x1xf32> to vector<16x24xf32>
    %56 = arith.mulf %51, %55 : vector<16x24xf32>
    %cst_33 = arith.constant dense<0.000000e+00> : vector<16x16xf32>
    %57 = tpu.matmul %56, %40, %cst_33 {dimension_numbers = #tpu.dot_dimension_numbers<[1], [0], [0], [1], [0, 0, 1, 1], [], []>} : vector<16x24xf32>, vector<24x16xf32>, vector<16x16xf32> -> vector<16x16xf32>
    %58 = vector.extract_strided_slice %11 {offsets = [0, 32], sizes = [16, 16], strides = [1, 1]} : vector<16x64xf32> to vector<16x16xf32>
    %59 = vector.extract_strided_slice %7 {offsets = [0, 32], sizes = [24, 16], strides = [1, 1]} : vector<24x64xf32> to vector<24x16xf32>
    %60 = vector.extract_strided_slice %9 {offsets = [0, 32], sizes = [24, 16], strides = [1, 1]} : vector<24x64xf32> to vector<24x16xf32>
    %cst_34 = arith.constant dense<0.000000e+00> : vector<16x24xf32>
    %61 = tpu.matmul %58, %59, %cst_34 {dimension_numbers = #tpu.dot_dimension_numbers<[1], [1], [0], [0], [0, 0, 1, 0], [], []>} : vector<16x16xf32>, vector<24x16xf32>, vector<16x24xf32> -> vector<16x24xf32>
    %62 = vector.broadcast %17 : vector<1x24xf32> to vector<16x24xf32>
    %63 = arith.addf %61, %62 : vector<16x24xf32>
    %c0_35 = arith.constant 0 : index
    %c2 = arith.constant 2 : index
    %c0_36 = arith.constant 0 : index
    %c0_37 = arith.constant 0 : index
    %64 = vector.load %arg10[%c0_35, %c2, %c0_36, %c0_37] : memref<1x4x16x24xf32, #tpu.memory_space<vmem>>, vector<1x1x16x24xf32>
    %65 = vector.shape_cast %64 : vector<1x1x16x24xf32> to vector<16x24xf32>
    %66 = arith.addf %63, %65 : vector<16x24xf32>
    %cst_38 = arith.constant dense<0xFF800000> : vector<16xf32>
    %67 = vector.multi_reduction <maximumf>, %66, %cst_38 [1] : vector<16x24xf32> to vector<16xf32>
    %68 = vector.shape_cast %67 : vector<16xf32> to vector<16x1xf32>
    %69 = vector.broadcast %68 : vector<16x1xf32> to vector<16x24xf32>
    %70 = arith.subf %66, %69 : vector<16x24xf32>
    %71 = math.exp %70 : vector<16x24xf32>
    %cst_39 = arith.constant dense<0.000000e+00> : vector<16xf32>
    %72 = vector.multi_reduction <add>, %71, %cst_39 [1] : vector<16x24xf32> to vector<16xf32>
    %73 = vector.shape_cast %72 : vector<16xf32> to vector<16x1xf32>
    %74 = tpu.reciprocal %73 {approx = true} : vector<16x1xf32> -> vector<16x1xf32>
    %75 = vector.broadcast %74 : vector<16x1xf32> to vector<16x24xf32>
    %76 = arith.mulf %71, %75 : vector<16x24xf32>
    %cst_40 = arith.constant dense<0.000000e+00> : vector<16x16xf32>
    %77 = tpu.matmul %76, %60, %cst_40 {dimension_numbers = #tpu.dot_dimension_numbers<[1], [0], [0], [1], [0, 0, 1, 1], [], []>} : vector<16x24xf32>, vector<24x16xf32>, vector<16x16xf32> -> vector<16x16xf32>
    %78 = vector.extract_strided_slice %11 {offsets = [0, 48], sizes = [16, 16], strides = [1, 1]} : vector<16x64xf32> to vector<16x16xf32>
    %79 = vector.extract_strided_slice %7 {offsets = [0, 48], sizes = [24, 16], strides = [1, 1]} : vector<24x64xf32> to vector<24x16xf32>
    %80 = vector.extract_strided_slice %9 {offsets = [0, 48], sizes = [24, 16], strides = [1, 1]} : vector<24x64xf32> to vector<24x16xf32>
    %cst_41 = arith.constant dense<0.000000e+00> : vector<16x24xf32>
    %81 = tpu.matmul %78, %79, %cst_41 {dimension_numbers = #tpu.dot_dimension_numbers<[1], [1], [0], [0], [0, 0, 1, 0], [], []>} : vector<16x16xf32>, vector<24x16xf32>, vector<16x24xf32> -> vector<16x24xf32>
    %82 = vector.broadcast %17 : vector<1x24xf32> to vector<16x24xf32>
    %83 = arith.addf %81, %82 : vector<16x24xf32>
    %c0_42 = arith.constant 0 : index
    %c3 = arith.constant 3 : index
    %c0_43 = arith.constant 0 : index
    %c0_44 = arith.constant 0 : index
    %84 = vector.load %arg10[%c0_42, %c3, %c0_43, %c0_44] : memref<1x4x16x24xf32, #tpu.memory_space<vmem>>, vector<1x1x16x24xf32>
    %85 = vector.shape_cast %84 : vector<1x1x16x24xf32> to vector<16x24xf32>
    %86 = arith.addf %83, %85 : vector<16x24xf32>
    %cst_45 = arith.constant dense<0xFF800000> : vector<16xf32>
    %87 = vector.multi_reduction <maximumf>, %86, %cst_45 [1] : vector<16x24xf32> to vector<16xf32>
    %88 = vector.shape_cast %87 : vector<16xf32> to vector<16x1xf32>
    %89 = vector.broadcast %88 : vector<16x1xf32> to vector<16x24xf32>
    %90 = arith.subf %86, %89 : vector<16x24xf32>
    %91 = math.exp %90 : vector<16x24xf32>
    %cst_46 = arith.constant dense<0.000000e+00> : vector<16xf32>
    %92 = vector.multi_reduction <add>, %91, %cst_46 [1] : vector<16x24xf32> to vector<16xf32>
    %93 = vector.shape_cast %92 : vector<16xf32> to vector<16x1xf32>
    %94 = tpu.reciprocal %93 {approx = true} : vector<16x1xf32> -> vector<16x1xf32>
    %95 = vector.broadcast %94 : vector<16x1xf32> to vector<16x24xf32>
    %96 = arith.mulf %91, %95 : vector<16x24xf32>
    %cst_47 = arith.constant dense<0.000000e+00> : vector<16x16xf32>
    %97 = tpu.matmul %96, %80, %cst_47 {dimension_numbers = #tpu.dot_dimension_numbers<[1], [0], [0], [1], [0, 0, 1, 1], [], []>} : vector<16x24xf32>, vector<24x16xf32>, vector<16x16xf32> -> vector<16x16xf32>
    %98 = tpu.concatenate %37, %57, %77, %97 in 1 : vector<16x16xf32>, vector<16x16xf32>, vector<16x16xf32>, vector<16x16xf32> -> vector<16x64xf32>
    %c0_48 = arith.constant 0 : index
    %c0_49 = arith.constant 0 : index
    %99 = vector.load %arg7[%c0_48, %c0_49] : memref<64x128xf32, #tpu.memory_space<vmem>>, vector<64x128xf32>
    %cst_50 = arith.constant dense<0.000000e+00> : vector<16x128xf32>
    %100 = tpu.matmul %98, %99, %cst_50 {dimension_numbers = #tpu.dot_dimension_numbers<[1], [0], [0], [1], [0, 0, 1, 1], [], []>} : vector<16x64xf32>, vector<64x128xf32>, vector<16x128xf32> -> vector<16x128xf32>
    %c0_51 = arith.constant 0 : index
    %c0_52 = arith.constant 0 : index
    %101 = vector.load %arg8[%c0_51, %c0_52] : memref<1x128xf32, #tpu.memory_space<vmem>>, vector<1x128xf32>
    %102 = vector.broadcast %101 : vector<1x128xf32> to vector<16x128xf32>
    %103 = arith.addf %100, %102 : vector<16x128xf32>
    %c0_53 = arith.constant 0 : index
    %c0_54 = arith.constant 0 : index
    %c0_55 = arith.constant 0 : index
    %104 = vector.load %arg11[%c0_53, %c0_54, %c0_55] : memref<1x16x128xf32, #tpu.memory_space<vmem>>, vector<1x16x128xf32>
    %105 = vector.shape_cast %104 : vector<1x16x128xf32> to vector<16x128xf32>
    %106 = vector.shape_cast %103 : vector<16x128xf32> to vector<1x16x128xf32>
    tpu.vector_store %arg11[%c0_53, %c0_54, %c0_55], %106 {strides = array<i32>} : memref<1x16x128xf32, #tpu.memory_space<vmem>>, vector<1x16x128xf32>,
    return
  }
  func.func @transform_0(%arg0: i32, %arg1: i32) -> (i32, i32, i32) {
    %c0_i32 = arith.constant 0 : i32
    %c0_i32_0 = arith.constant 0 : i32
    return %arg0, %arg1, %c0_i32 : i32, i32, i32
  }
  func.func @transform_1(%arg0: i32, %arg1: i32) -> (i32, i32, i32) {
    %c0_i32 = arith.constant 0 : i32
    %c0_i32_0 = arith.constant 0 : i32
    %c0_i32_1 = arith.constant 0 : i32
    return %arg0, %c0_i32, %c0_i32_0 : i32, i32, i32
  }
  func.func @transform_2(%arg0: i32, %arg1: i32) -> (i32, i32) {
    %c0_i32 = arith.constant 0 : i32
    %c0_i32_0 = arith.constant 0 : i32
    %c0_i32_1 = arith.constant 0 : i32
    return %c0_i32, %c0_i32_0 : i32, i32
  }
  func.func @transform_3(%arg0: i32, %arg1: i32) -> (i32, i32) {
    %c0_i32 = arith.constant 0 : i32
    %c0_i32_0 = arith.constant 0 : i32
    %c0_i32_1 = arith.constant 0 : i32
    return %c0_i32, %c0_i32_0 : i32, i32
  }
  func.func @transform_4(%arg0: i32, %arg1: i32) -> (i32, i32) {
    %c0_i32 = arith.constant 0 : i32
    %c0_i32_0 = arith.constant 0 : i32
    %c0_i32_1 = arith.constant 0 : i32
    return %c0_i32, %c0_i32_0 : i32, i32
  }
  func.func @transform_5(%arg0: i32, %arg1: i32) -> (i32, i32) {
    %c0_i32 = arith.constant 0 : i32
    %c0_i32_0 = arith.constant 0 : i32
    %c0_i32_1 = arith.constant 0 : i32
    return %c0_i32, %c0_i32_0 : i32, i32
  }
  func.func @transform_6(%arg0: i32, %arg1: i32) -> (i32, i32) {
    %c0_i32 = arith.constant 0 : i32
    %c0_i32_0 = arith.constant 0 : i32
    %c0_i32_1 = arith.constant 0 : i32
    return %c0_i32, %c0_i32_0 : i32, i32
  }
  func.func @transform_7(%arg0: i32, %arg1: i32) -> (i32, i32, i32) {
    %c0_i32 = arith.constant 0 : i32
    %c0_i32_0 = arith.constant 0 : i32
    %c0_i32_1 = arith.constant 0 : i32
    return %arg0, %c0_i32, %c0_i32_0 : i32, i32, i32
  }
  func.func @transform_8(%arg0: i32, %arg1: i32) -> (i32, i32, i32, i32) {
    %c0_i32 = arith.constant 0 : i32
    %c0_i32_0 = arith.constant 0 : i32
    %c0_i32_1 = arith.constant 0 : i32
    return %arg0, %c0_i32, %arg1, %c0_i32_0 : i32, i32, i32, i32
  }
  func.func @transform_9(%arg0: i32, %arg1: i32) -> (i32, i32, i32) {
    %c0_i32 = arith.constant 0 : i32
    %c0_i32_0 = arith.constant 0 : i32
    return %arg0, %arg1, %c0_i32 : i32, i32, i32
  }
}

</mosaic_0001>

<bundles_post_ra>
// kernel: tpu_custom_call.1
= control target key start
LH: loop header
LB: loop body
LE: loop exit
PB: predicated region body
PF: predicated region fallthrough
CT: control target
= control target key end

     0   :  { %s3507_s0 = inlined_call_operand.hbm [shape: f32[2,16,32], index: 0, kind: input, shape index: {}]   ;;  %s3508_s1 = inlined_call_operand.hbm [shape: f32[2,24,48], index: 1, kind: input, shape index: {}]   ;;  %s3509_s2 = inlined_call_operand.hbm [shape: f32[32,64], index: 2, kind: input, shape index: {}]   ;;  %s3510_s3 = inlined_call_operand.hbm [shape: f32[48,64], index: 3, kind: input, shape index: {}]   ;;  %s3511_s4 = inlined_call_operand.hbm [shape: f32[48,64], index: 4, kind: input, shape index: {}]   ;;  %s3512_s5 = inlined_call_operand.hbm [shape: f32[64,128], index: 5, kind: input, shape index: {}]   ;;  %s3513_s6 = inlined_call_operand.vmem [shape: f32[1,128], index: 6, kind: input, shape index: {}]   ;;  %s3514_s7 = inlined_call_operand.vmem [shape: f32[2,1,24], index: 7, kind: input, shape index: {}]   ;;  %s3515_s8 = inlined_call_operand.hbm [shape: f32[2,4,16,24], index: 8, kind: input, shape index: {}]   ;;  %s3516_s9 = inlined_call_operand.hbm [shape: f32[2,16,128], index: 9, kind: output, shape index: {}]  }
   0x1   :  { %3538 = sst [smem:[#allocation28_spill]] %s3507_s0 }
   0x2   :  { %3539 = sst [smem:[#allocation29_spill]] %s3509_s2 }
   0x3   :  { %3540 = sst [smem:[#allocation30_spill]] %s3510_s3 }
   0x4   :  { %3541 = sst [smem:[#allocation31_spill]] %s3513_s6 }
   0x5   :  { %3542 = sst [smem:[#allocation32_spill]] %s3514_s7 }
   0x6   :  { %3543 = sst [smem:[#allocation33_spill]] %s3516_s9 }
   0x7   :  { %14 = vsyncpa [#allocation3], 0 }
   0x8   :  { %16 = vsyncpa [#allocation3 + $0x1], 0 }
   0x9   :  { %17 = vsyncpa [#allocation6], 0 }
   0xa   :  { %19 = vsyncpa [#allocation6 + $0x1], 0 }
   0xb   :  { %20 = vsyncpa [#allocation9], 0 }
   0xc   :  { %21 = vsyncpa [#allocation12], 0 }
   0xd   :  { %22 = vsyncpa [#allocation4], 0 }
   0xe   :  { %24 = vsyncpa [#allocation4 + $0x1], 0  ;;  %s2917_s30 = smov 0   ;;  %s2919_s10 = smov 0  }
   0xf   :  { %s2921_s11 = smov 0   ;;  %s2923_s12 = smov 0  }
  0x10   :  { %s2925_s13 = smov 0   ;;  %s2927_s14 = smov 0  }
  0x11 LB: > { %3544 = sst [smem:[#allocation22_spill]] %s2824_s30  ;;  %s2948_s15 = sadd.s32 4294967295, %s2844_s14   ;;  %s2844_s14 = sphi %s2927_s14, %s30_s14   ;;  %s2840_s13 = sphi %s2925_s13, %s3595_s13   ;;  %s2836_s12 = sphi %s2923_s12, %s3594_s12   ;;  %s2832_s11 = sphi %s2921_s11, %s3590_s11   ;;  %s2828_s10 = sphi %s2919_s10, %s3593_s10   ;;  %s2824_s30 = sphi %s2917_s30, %s3592_s30  }
  0x12   : > { %3545 = sst [smem:[#allocation23_spill]] %s2832_s11  ;;  %s1973_s16 = sadd.s32 4294967294, %s2844_s14  }
  0x13   : > { %p64_p0 = scmp.ne.s32.totalorder %s2828_s10, %s2824_s30  ;;  %p3517_p1 = scmp.eq.s32.totalorder %s2948_s15, 0 }
  0x14   : > { %p281_p3 = scmp.eq.s32.totalorder %s1973_s16, 1  ;;  %p1974_p5 = scmp.ge.s32.totalorder %s2844_s14, 1 }
  0x15   : > { %p2957_p4 = por %p3517_p1, %p64_p0  ;;  %p288_p7 = scmp.lt.s32.totalorder %s2844_s14, 3 }
  0x16   : > { %p2962_p6 = por %p281_p3, %p64_p0  ;;  %s2846_s20 = smov [#allocation7]  }
  0x17   : > { %s3546_s17 = scalar_select %p2957_p4, 1, 0 }
  0x18   : > { %s3547_s18 = scalar_select %p2962_p6, 1, 0 }
  0x19   : > { %p2967_p8 = pnand %p1974_p5, %p288_p7  ;;  %s300_s21 = sshll.u32 %s2846_s20, 4  ;;  %s2971_s21 = int_to_ptr.vmem [resolvable:$true] %s300_s21 }
  0x1a   : > { %3548 = sst [smem:[#allocation24_spill]] %s3547_s18  ;;  %s2847_s23 = smov [#allocation8]  }
  0x1b   : > { %s3549_s19 = scalar_select %p2967_p8, 1, 0 }
  0x1c   : > { %p2376_p9 = pneg %p2967_p8  ;;  %s313_s24 = sshll.u32 %s2847_s23, 4  ;;  %s2982_s24 = int_to_ptr.vmem [resolvable:$true] %s313_s24 }
  0x1d   : > { %s3551_s2 = sld [smem:[#allocation29_spill]] }
  0x1e   : > { %p2978_p11 = pnand %p2376_p9, %p3517_p1 }
  0x20   : > { %s3550_s22 = scalar_select %p2978_p11, 1, 0 }
  0x21   : > { %p2992_p13 = pneg %p2978_p11 }
  0x23   : > { %s2540_s27 = scalar_lea.hbm %s3551_s2, 512 }
  0x24   : > { %p2541_p12 = scmp.ne.s32.totalorder %s3551_s2, %s2540_s27  ;;  %p2547_p5 = scmp.lt.u32.totalorder %s2540_s27, %s3551_s2 }
  0x25   : > { %s3552_s16 = scalar_select %p2992_p13, 1, 0 }
  0x26   : > { %p2543_p0 = pnand %p2992_p13, %p2541_p12 }
  0x28   : > { %p2544_p3 = pneg %p2543_p0 }
  0x2a   : > { %p2549_p7 = pnand %p2547_p5, %p2544_p3 }
  0x2c   : > { %2552 = shalt.err (!%p2549_p7)
}
  0x2d   : > { %s2553_s25 = scalar_lea.vmem %s2971_s21, 512  ;;  %p2561_p2 = scmp.lt.s32.totalorder %s2971_s21, %s2971_s21 }
  0x2e   : > { %p2554_p9 = scmp.ne.s32.totalorder %s2971_s21, %s2553_s25  ;;  %p2562_p6 = scmp.lt.s32.totalorder %s2553_s25, %s2553_s25 }
  0x30   : > { %p2556_p10 = pnand %p2554_p9, %p2992_p13  ;;  %p2563_p12 = por %p2562_p6, %p2561_p2 }
  0x32   : > { %p2557_p1 = pneg %p2556_p10 }
  0x34   : > { %p2564_p0 = pnand %p2563_p12, %p2557_p1 }
  0x36   : > { %2567 = shalt.err (!%p2564_p0)
}
  0x37   : > { %s3521_s26 = smov 128   ;;  %s3523_s27 = smov 8  }
  0x38   : > { %2379 = dma.hbm_to_vmem [thread:$0]  (!%p2978_p11), %s3551_s2, 512, %s2971_s21, [#allocation6], %s3521_s26, %s3521_s26, %s3523_s27  }
  0x39   : > { %s3553_s3 = sld [smem:[#allocation30_spill]] }
  0x3f   : > { %s2568_s25 = scalar_lea.hbm %s3553_s3, 768 }
  0x40   : > { %p2569_p1 = scmp.ne.s32.totalorder %s3553_s3, %s2568_s25  ;;  %p2575_p10 = scmp.lt.u32.totalorder %s2568_s25, %s3553_s3 }
  0x42   : > { %p2571_p2 = pnand %p2569_p1, %p2992_p13 }
  0x44   : > { %p2572_p6 = pneg %p2571_p2 }
  0x46   : > { %p2577_p3 = pnand %p2575_p10, %p2572_p6 }
  0x48   : > { %2580 = shalt.err (!%p2577_p3)
}
  0x49   : > { %s2581_s21 = scalar_lea.vmem %s2982_s24, 768  ;;  %p2589_p12 = scmp.lt.s32.totalorder %s2982_s24, %s2982_s24 }
  0x4a   : > { %p2582_p5 = scmp.ne.s32.totalorder %s2982_s24, %s2581_s21  ;;  %p2590_p0 = scmp.lt.s32.totalorder %s2581_s21, %s2581_s21 }
  0x4c   : > { %p2584_p7 = pnand %p2582_p5, %p2992_p13  ;;  %p2591_p1 = por %p2590_p0, %p2589_p12 }
  0x4e   : > { %p2585_p9 = pneg %p2584_p7 }
  0x50   : > { %p2592_p2 = pnand %p2591_p1, %p2585_p9 }
  0x52   : > { %2595 = shalt.err (!%p2592_p2)
}
  0x53   : > { %2382 = dma.hbm_to_vmem [thread:$0]  (!%p2978_p11), %s3553_s3, 768, %s2982_s24, [#allocation9], %s3521_s26, %s3521_s26, %s3523_s27  }
  0x54   : > { %s42_s30 = sadd.s32 1, %s2840_s13  ;;  %s51_s18 = sadd.s32 1, %s2832_s11 }
  0x55   : > { %p44_p6 = scmp.ge.s32.totalorder %s42_s30, 2  ;;  %p58_p10 = scmp.ne.s32.totalorder %s2832_s11, %s2828_s10 }
  0x56   : > { %p59_p3 = scmp.eq.s32.totalorder %s2844_s14, 0  ;;  %p2407_p5 = scmp.lt.s32.totalorder %s2844_s14, 2 }
  0x57   : > { %s3597_s30 = smov (%p44_p6, %s42_s30), 0  ;;  %p3555_p9 = scmp.eq.s32.totalorder %s2948_s15, 1 }
  0x58   : > { %3554 = sst [smem:[#allocation25_spill]] %s3597_s30  ;;  %p60_p7 = por %p59_p3, %p58_p10 }
  0x59   : > { %p3052_p12 = por %p3555_p9, %p58_p10  ;;  %s46_s29 = ssub.s32 %s2840_s13, %s3597_s30 }
  0x5a   : > { %p49_p0 = scmp.eq.s32.totalorder %s46_s29, 0  ;;  %s3060_s24 = sand.u32 1, %s2832_s11  }
  0x5b   : > { %s3556_s28 = scalar_select %p3052_p12, 1, 0 }
  0x5c   : > { %s2046_s23 = sshll.u32 %s2840_s13, 8  ;;  %s1980_s21 = sshll.u32 %s3060_s24, 4 }
  0x5d   : > { %3557 = sst [smem:[#allocation26_spill]] %s3556_s28  ;;  %s3559_s0 = sld [smem:[#allocation28_spill]] }
  0x5e   : > { %s3064_s25 = scalar_select %p49_p0, %s2832_s11, %s51_s18  }
  0x5f   : > { %p3072_p1 = pnand %p2407_p5, %p60_p7  ;;  %s360_s29 = scalar_lea.vmem [#allocation2], %s1980_s21 }
  0x60   : > { %3558 = sst [smem:[#allocation27_spill]] %s3064_s25  ;;  %s369_s20 = sshll.u32 %s360_s29, 4  ;;  %s3076_s20 = int_to_ptr.vmem [resolvable:$true] %s369_s20 }
  0x61   : > { %s3560_s27 = scalar_select %p3072_p1, 1, 0 }
  0x62   : > { %s3561_s18 = sand.u32 1, %s2844_s14   ;;  %p3086_p6 = pneg %p3072_p1 }
  0x63   : > { %s3070_s26 = scalar_lea.hbm %s3559_s0, %s2046_s23  ;;  %s3080_s2 = scalar_lea.sflag [#allocation3], %s3561_s18 }
  0x64   : > { %s2596_s3 = scalar_lea.hbm %s3070_s26, 256  ;;  %s2601_s21 = scalar_lea.hbm %s3559_s0, 512 }
  0x65   : > { %p2597_p2 = scmp.ne.s32.totalorder %s3070_s26, %s2596_s3  ;;  %p2602_p5 = scmp.lt.u32.totalorder %s3070_s26, %s3559_s0 }
  0x66   : > { %p2603_p7 = scmp.lt.u32.totalorder %s2601_s21, %s2596_s3  ;;  %p2605_p0 = scmp.lt.u32.totalorder %s2596_s3, %s3070_s26 }
  0x67   : > { %p2599_p10 = pnand %p3086_p6, %p2597_p2 }
  0x68   : > { %p2604_p9 = por %p2603_p7, %p2602_p5 }
  0x69   : > { %p2600_p3 = pneg %p2599_p10 }
  0x6a   : > { %p2606_p12 = por %p2605_p0, %p2604_p9 }
  0x6c   : > { %p2607_p4 = pnand %p2606_p12, %p2600_p3 }
  0x6e   : > { %2610 = shalt.err (!%p2607_p4)
}
  0x6f   : > { %s2611_s18 = scalar_lea.vmem %s3076_s20, 256  ;;  %s2850_s6 = smov [#allocation2]  }
  0x70   : > { %p2612_p2 = scmp.ne.s32.totalorder %s3076_s20, %s2611_s18  ;;  %s2616_s9 = sshll.u32 %s2850_s6, 4  ;;  %s2617_s9 = int_to_ptr.vmem [resolvable:$false] %s2616_s9 }
  0x71   : > { %s2618_s30 = scalar_lea.vmem %s2617_s9, 512  ;;  %p2619_p11 = scmp.lt.s32.totalorder %s3076_s20, %s2617_s9 }
  0x72   : > { %p2614_p10 = pnand %p2612_p2, %p3086_p6  ;;  %p2620_p13 = scmp.lt.s32.totalorder %s2618_s30, %s2611_s18 }
  0x74   : > { %p2615_p8 = pneg %p2614_p10  ;;  %p2621_p5 = por %p2620_p13, %p2619_p11 }
  0x76   : > { %p2622_p7 = pnand %p2621_p5, %p2615_p8 }
  0x78   : > { %2625 = shalt.err (!%p2622_p7)
}
  0x79   : > { %s3563_s3 = smov 8   ;;  %s3564_s21 = smov 128  }
  0x7a   : > { %2392 = dma.hbm_to_vmem [thread:$0]  (!%p3072_p1), %s3070_s26, 256, %s3076_s20, %s3080_s2, %s3564_s21, %s3564_s21, %s3563_s3  }
  0x7b   : > { %s2851_s29 = smov [#allocation10]   ;;  %s2852_s6 = smov [#allocation11]  }
  0x7c   : > { %s326_s0 = sshll.u32 %s2851_s29, 4  ;;  %s339_s25 = sshll.u32 %s2852_s6, 4  ;;  %s327_s0 = int_to_ptr.vmem [resolvable:$true] %s326_s0  ;;  %s3113_s25 = int_to_ptr.vmem [resolvable:$true] %s339_s25 }
  0x7d   : > { %s2626_s30 = scalar_lea.hbm %s3511_s4, 768  ;;  %p3565_p8 = scmp.ne.s32.totalorder %s3552_s16, 0 }
  0x7e   : > { %p2627_p4 = scmp.ne.s32.totalorder %s3511_s4, %s2626_s30  ;;  %p2633_p12 = scmp.lt.u32.totalorder %s2626_s30, %s3511_s4 }
  0x80   : > { %p2629_p11 = pnand %p2627_p4, %p3565_p8 }
  0x82   : > { %p2630_p13 = pneg %p2629_p11 }
  0x84   : > { %p2635_p3 = pnand %p2633_p12, %p2630_p13 }
  0x86   : > { %2638 = shalt.err (!%p2635_p3)
}
  0x87   : > { %s2639_s20 = scalar_lea.vmem %s327_s0, 768  ;;  %p2647_p10 = scmp.lt.s32.totalorder %s327_s0, %s327_s0 }
  0x88   : > { %p2640_p9 = scmp.ne.s32.totalorder %s327_s0, %s2639_s20  ;;  %p2648_p5 = scmp.lt.s32.totalorder %s2639_s20, %s2639_s20 }
  0x8a   : > { %p2642_p0 = pnand %p2640_p9, %p3565_p8  ;;  %p2649_p7 = por %p2648_p5, %p2647_p10 }
  0x8c   : > { %p2643_p2 = pneg %p2642_p0 }
  0x8e   : > { %p2650_p1 = pnand %p2649_p7, %p2643_p2 }
  0x90   : > { %2653 = shalt.err (!%p2650_p1)
}
  0x91   : > { %p3566_p4 = scmp.ne.s32.totalorder %s3550_s22, 0  ;;  %s2654_s6 = scalar_lea.hbm %s3512_s5, 1024 }
  0x92   : > { %p2655_p11 = scmp.ne.s32.totalorder %s3512_s5, %s2654_s6  ;;  %p2661_p12 = scmp.lt.u32.totalorder %s2654_s6, %s3512_s5 }
  0x93   : > { %2385 = dma.hbm_to_vmem [thread:$0]  (!%p3566_p4), %s3511_s4, 768, %s327_s0, [#allocation9], %s3564_s21, %s3564_s21, %s3563_s3  }
  0x94   : > { %p2657_p1 = pnand %p2655_p11, %p3565_p8 }
  0x96   : > { %p2658_p13 = pneg %p2657_p1 }
  0x98   : > { %p2663_p3 = pnand %p2661_p12, %p2658_p13 }
  0x9a   : > { %2666 = shalt.err (!%p2663_p3)
}
  0x9b   : > { %s2667_s0 = scalar_lea.vmem %s3113_s25, 1024  ;;  %p2675_p10 = scmp.lt.s32.totalorder %s3113_s25, %s3113_s25 }
  0x9c   : > { %p2668_p9 = scmp.ne.s32.totalorder %s3113_s25, %s2667_s0  ;;  %p2676_p5 = scmp.lt.s32.totalorder %s2667_s0, %s2667_s0 }
  0x9e   : > { %p2670_p0 = pnand %p2668_p9, %p3565_p8  ;;  %p2677_p7 = por %p2676_p5, %p2675_p10 }
  0xa0   : > { %p2671_p2 = pneg %p2670_p0 }
  0xa2   : > { %p2678_p11 = pnand %p2677_p7, %p2671_p2 }
  0xa4   : > { %2681 = shalt.err (!%p2678_p11)
}
  0xa5   : > { %2388 = dma.hbm_to_vmem [thread:$0]  (!%p3566_p4), %s3512_s5, 1024, %s3113_s25, [#allocation12], %s3564_s21, %s3564_s21, %s3563_s3  }
  0xa6   : > { %s2349_s16 = smul.u32 24, %s3060_s24  ;;  %s2047_s29 = sshll.u32 %s2840_s13, 10 }
  0xa7   : > { %s2350_s28 = smul.u32 384, %s2840_s13  ;;  %s3176_s25 = scalar_lea.hbm %s3515_s8, %s2047_s29 }
  0xa8   : > { %s383_s9 = scalar_lea.vmem [#allocation5], %s2349_s16  ;;  %s3567_s20 = sand.u32 1, %s2844_s14  }
  0xa9   : > { %s3169_s18 = scalar_lea.hbm %s3508_s1, %s2350_s28  ;;  %s390_s30 = sshll.u32 %s383_s9, 4  ;;  %s3171_s30 = int_to_ptr.vmem [resolvable:$true] %s390_s30 }
  0xaa   : > { %s3180_s7 = scalar_lea.sflag [#allocation6], %s3567_s20  ;;  %s2682_s11 = scalar_lea.hbm %s3169_s18, 384 }
  0xab   : > { %p2683_p8 = scmp.ne.s32.totalorder %s3169_s18, %s2682_s11  ;;  %s2687_s16 = scalar_lea.hbm %s3508_s1, 768 }
  0xac   : > { %p2688_p13 = scmp.lt.u32.totalorder %s3169_s18, %s3508_s1  ;;  %p2689_p12 = scmp.lt.u32.totalorder %s2687_s16, %s2682_s11 }
  0xad   : > { %p2685_p4 = pnand %p2683_p8, %p3086_p6  ;;  %p2691_p9 = scmp.lt.u32.totalorder %s2682_s11, %s3169_s18 }
  0xae   : > { %p2690_p3 = por %p2689_p12, %p2688_p13 }
  0xaf   : > { %p2686_p1 = pneg %p2685_p4 }
  0xb0   : > { %p2692_p0 = por %p2691_p9, %p2690_p3 }
  0xb2   : > { %p2693_p2 = pnand %p2692_p0, %p2686_p1 }
  0xb4   : > { %2696 = shalt.err (!%p2693_p2)
}
  0xb5   : > { %s2697_s29 = scalar_lea.vmem %s3171_s30, 384  ;;  %s2853_s26 = smov [#allocation5]  }
  0xb6   : > { %p2698_p10 = scmp.ne.s32.totalorder %s3171_s30, %s2697_s29  ;;  %s2702_s0 = sshll.u32 %s2853_s26, 4  ;;  %s2703_s0 = int_to_ptr.vmem [resolvable:$false] %s2702_s0 }
  0xb7   : > { %s2704_s20 = scalar_lea.vmem %s2703_s0, 768  ;;  %p2705_p11 = scmp.lt.s32.totalorder %s3171_s30, %s2703_s0 }
  0xb8   : > { %p2700_p5 = pnand %p2698_p10, %p3086_p6  ;;  %p2706_p8 = scmp.lt.s32.totalorder %s2704_s20, %s2697_s29 }
  0xba   : > { %p2701_p7 = pneg %p2700_p5  ;;  %p2707_p4 = por %p2706_p8, %p2705_p11 }
  0xbc   : > { %p2708_p13 = pnand %p2707_p4, %p2701_p7 }
  0xbe   : > { %2711 = shalt.err (!%p2708_p13)
}
  0xbf   : > { %p3568_p1 = scmp.ne.s32.totalorder %s3560_s27, 0  ;;  %s3569_s11 = sshll.u32 %s3060_s24, 6 }
  0xc0   : > { %s410_s28 = scalar_lea.vmem [#allocation13], %s3569_s11  ;;  %s2712_s16 = scalar_lea.hbm %s3176_s25, 1024 }
  0xc1   : > { %2395 = dma.hbm_to_vmem [thread:$0]  (!%p3568_p1), %s3169_s18, 384, %s3171_s30, %s3180_s7, %s3564_s21, %s3564_s21, %s3563_s3  }
  0xc2   : > { %s419_s6 = sshll.u32 %s410_s28, 4  ;;  %p2713_p12 = scmp.ne.s32.totalorder %s3176_s25, %s2712_s16  ;;  %s3209_s6 = int_to_ptr.vmem [resolvable:$true] %s419_s6 }
  0xc3   : > { %s2717_s29 = scalar_lea.hbm %s3515_s8, 2048  ;;  %p2718_p0 = scmp.lt.u32.totalorder %s3176_s25, %s3515_s8 }
  0xc4   : > { %p2715_p3 = pnand %p2713_p12, %p3086_p6  ;;  %p2719_p2 = scmp.lt.u32.totalorder %s2717_s29, %s2712_s16 }
  0xc5   : > { %p2721_p5 = scmp.lt.u32.totalorder %s2712_s16, %s3176_s25 }
  0xc6   : > { %p2716_p9 = pneg %p2715_p3  ;;  %p2720_p10 = por %p2719_p2, %p2718_p0 }
  0xc8   : > { %p2722_p7 = por %p2721_p5, %p2720_p10 }
  0xca   : > { %p2723_p11 = pnand %p2722_p7, %p2716_p9 }
  0xcc   : > { %2726 = shalt.err (!%p2723_p11)
}
  0xcd   : > { %s2727_s24 = scalar_lea.vmem %s3209_s6, 1024  ;;  %s2854_s18 = smov [#allocation13]  }
  0xce   : > { %p2728_p8 = scmp.ne.s32.totalorder %s3209_s6, %s2727_s24  ;;  %s2732_s30 = sshll.u32 %s2854_s18, 4  ;;  %s2733_s30 = int_to_ptr.vmem [resolvable:$false] %s2732_s30 }
  0xcf   : > { %s2734_s7 = scalar_lea.vmem %s2733_s30, 2048  ;;  %p2735_p12 = scmp.lt.s32.totalorder %s3209_s6, %s2733_s30 }
  0xd0   : > { %p2730_p4 = pnand %p2728_p8, %p3086_p6  ;;  %p2736_p3 = scmp.lt.s32.totalorder %s2734_s7, %s2727_s24 }
  0xd2   : > { %p2731_p13 = pneg %p2730_p4  ;;  %p2737_p0 = por %p2736_p3, %p2735_p12 }
  0xd4   : > { %p2738_p2 = pnand %p2737_p0, %p2731_p13 }
  0xd6   : > { %2741 = shalt.err (!%p2738_p2)
}
  0xd7   : > { %2398 = dma.hbm_to_vmem [thread:$0]  (!%p3568_p1), %s3176_s25, 1024, %s3209_s6, %s3080_s2, %s3564_s21, %s3564_s21, %s3563_s3  }
  0xd8   : > { %p3570_p6 = scmp.ne.s32.totalorder %s3549_s19, 0 }
  0xd9   : > { %s433_s23 = sand.u32 (!%p3570_p6), 1, %s2948_s15   ;;  %s3240_s20 = sand.u32 (!%p3570_p6), 1, %s2828_s10  }
  0xda   : > { %431 = sbr.rel (%p3570_p6) target bundleno = 2297 (0x8f9), region = 56  ;;  %s1988_s11 = sshll.u32 (!%p3570_p6), %s3240_s20, 4 }
  0xdb   : > { %s434_s27 = scalar_lea.sflag (!%p3570_p6), [#allocation3], %s433_s23  ;;  %s3245_s28 = scalar_lea.vmem (!%p3570_p6), [#allocation2], %s1988_s11 }
  0xdc   : > { %p3571_p9 = scmp.ne.s32.totalorder (!%p3570_p6), %s3546_s17, 0 }
  0xe1   : > { %2795 = dma.done.wait (%p3571_p9), %s434_s27, 256  }
  0xe2   : > { %2797 = vsyncadd (%p3571_p9), %s434_s27, 4294967040  ;;  %s2351_s2 = smul.u32 24, %s3240_s20  ;;  %s443_s19 = scalar_lea.sflag [#allocation6], %s433_s23 }
  0xe4   : > { %s3252_s3 = scalar_lea.vmem [#allocation5], %s2351_s2 }
  0xe5   : > { %2799 = dma.done.wait (%p3571_p9), %s443_s19, 384  }
  0xe6   : > { %2801 = vsyncadd (%p3571_p9), %s443_s19, 4294966912  ;;  %p3572_p1 = scmp.eq.s32.totalorder %s2948_s15, 0 }
  0xe8   : > { %2803 = dma.done.wait (%p3572_p1), [#allocation6], 512   ;;  %p3573_p10 = pmov %p3572_p1 }
  0xe9   : > { %p3574_p5 = pmov %p3572_p1 }
  0xea   : > { %2805 = vsyncadd (%p3573_p10), [#allocation6], 4294966784 }
  0xeb   : > { %2807 = dma.done.wait (%p3574_p5), [#allocation9], 1536   ;;  %p3575_p7 = pmov %p3572_p1 }
  0xec   : > { %p3576_p11 = pmov %p3572_p1 }
  0xed   : > { %2809 = vsyncadd (%p3575_p7), [#allocation9], 4294965760 }
  0xee   : > { %2811 = dma.done.wait (%p3576_p11), [#allocation12], 1024   ;;  %p3577_p8 = pmov %p3572_p1 }
  0xef   : > { %s1993_s21 = sshll.u32 %s3240_s20, 6 }
  0xf0   : > { %2813 = vsyncadd (%p3577_p8), [#allocation12], 4294966272  ;;  %s3271_s25 = scalar_lea.vmem [#allocation13], %s1993_s21 }
  0xf1   : > { %2815 = dma.done.wait (%p3571_p9), %s434_s27, 1024  }
  0xf2   : > { %2817 = vsyncadd (%p3571_p9), %s434_s27, 4294966272  ;;  %v2855_v0 = vmov 0.0|0.0   ;;  %vm2856_vm0 = vmmov 0   ;;  %v2857_v1 = vmov 0.0   ;;  %v616_v2 = vld [vmem:[#allocation8] sm:$0xff]  ;;  %v617_v3 = vld [vmem:[#allocation8 + $0x8] sm:$0xff] }
  0xf3   : > { %2275 = vmatprep.subr.bf16.mxu1 %v2855_v0  ;;  %2146 = vmatprep.mubr.msk.f32.mxu1 %vm2856_vm0, %v2857_v1  ;;  %v618_v4 = vld [vmem:[#allocation8 + $0x10] sm:$0xff]  ;;  %v2276_v5 = vpack.c.bf16 %v617_v3, %v616_v2  ;;  %v619_v6 = vld [vmem:[#allocation8 + $0x18] sm:$0xff]  ;;  %v530_v7 = vld [vmem:[#allocation7] sm:$0xff]  ;;  %vm534_vm1 = vcmask 261120   ;;  %vm622_vm2 = vcmask 392192   ;;  %vm809_vm3 = vcmask 130048  }
  0xf4   : > { %v531_v8 = vld [vmem:[#allocation7 + $0x8] sm:$0xff]  ;;  %v2279_v9 = vpack.c.bf16 %v619_v6, %v618_v4  ;;  %v532_v11 = vld [vmem:[#allocation7 + $0x10] sm:$0xff]  ;;  %v533_v12 = vld [vmem:[#allocation7 + $0x18] sm:$0xff]  ;;  %s2858_s15 = smov 96   ;;  %s2859_s17 = smov 112   ;;  %v804_v2 = vlaneseq  ;;  %vm904_vm5 = vcmask 195584  }
  0xf5   : > { %2277 = vmatpush3.bf16.msra.mxu1 %v2276_v5  ;;  %v2267_v10 = vpack.c.bf16 %v531_v8, %v530_v7  ;;  %v620_v13 = vld [vmem:[#allocation8 + $0x20] sm:$0xff]  ;;  %v621_v14 = vld [vmem:[#allocation8 + $0x28] sm:$0xff]  ;;  %v2271_v15 = vpack.c.bf16 %v533_v12, %v532_v11  ;;  %v528_v20 = vld [vmem:[%s3252_s3 + $0x8] sm:$0xff]  ;;  %p520_p4 = scmp.lt.s32.totalorder %s2836_s12, 1  ;;  %s3580_s9 = sld [smem:[#allocation32_spill]]  ;;  %vm1692_vm6 = vcmask 523264  }
  0xf6   : > { %2278 = vmatprep.subr.bf16.mxu1 %v2855_v0  ;;  %v525_v16 = vld [vmem:[%s3245_s28] sm:$0xff]  ;;  %v2282_v17 = vpack.c.bf16 %v621_v14, %v620_v13  ;;  %v526_v18 = vld [vmem:[%s3245_s28 + $0x8] sm:$0xff]  ;;  %v529_v21 = vld [vmem:[%s3252_s3 + $0x10] sm:$0xff]  ;;  %v805_v5 = vshrl.u32 %v804_v2, 7  ;;  %s2860_s26 = smov 80   ;;  %s2861_s0 = smov 16  }
  0xf7   : > { %2268 = vmatprep.subr.bf16.mxu0 %v2267_v10  ;;  %2131 = vmatprep.mubr.msk.f32.mxu0 %vm534_vm1, %v525_v16  ;;  %v527_v19 = vld [vmem:[%s3252_s3] sm:$0xff]  ;;  %v713_v23 = vld [vmem:[#allocation10 + $0x8] sm:$0xff]  ;;  %v714_v24 = vld [vmem:[#allocation10 + $0x10] sm:$0xff]  ;;  %s521_s6 = scalar_select %p520_p4, %s2836_s12, 1 }
  0xf8   : > { %2270 = vmatpush3.bf16.msra.mxu0 %v2267_v10  ;;  %v712_v22 = vld [vmem:[#allocation10] sm:$0xff]  ;;  %v715_v26 = vld [vmem:[#allocation10 + $0x18] sm:$0xff]  ;;  %v717_v29 = vld [vmem:[#allocation10 + $0x28] sm:$0xff]  ;;  %v806_v7 = vsub.s32 0, %v805_v5  ;;  %s2862_s24 = smov 32   ;;  %s2863_s18 = smov 48  }
  0xf9   : > { %2280 = vmatpush3.bf16.msra.mxu1 %v2279_v9  ;;  %2272 = vmatprep.subr.bf16.mxu0 %v2271_v15  ;;  %v2285_v25 = vpack.c.bf16 %v713_v23, %v712_v22  ;;  %v2288_v27 = vpack.c.bf16 %v715_v26, %v714_v24  ;;  %v716_v28 = vld [vmem:[#allocation10 + $0x20] sm:$0xff]  ;;  %vm3304_vm4 = vmpackc.low %vm809_vm3, %vm809_vm3  ;;  %v901_v10 = vld [vmem:[%s3271_s25 + $0x8] sm:$0xff]  ;;  %s3581_s30 = sld [smem:[#allocation26_spill]]  ;;  %s518_s7 = scalar_lea.vmem [#allocation14], %s1988_s11 }
  0xfa   : > { %2281 = vmatprep.subr.bf16.mxu1 %v2855_v0  ;;  %v2291_v30 = vpack.c.bf16 %v717_v29, %v716_v28  ;;  %v900_v13 = vld [vmem:[%s3271_s25] sm:$0xff]  ;;  %v2017_v24 = vld [vmem:[%s3271_s25 + $0x18] sm:$0xff]  ;;  %s1792_s23 = sshll.u32 %s518_s7, 4  ;;  %s3582_s2 = sld [smem:[#allocation31_spill]]  ;;  %s3453_s23 = int_to_ptr.vmem [resolvable:$true] %s1792_s23 }
  0xfb   : > { %s522_s29 = scalar_lea.vmem %s3580_s9, %s521_s6  ;;  %s2048_s19 = sshll.u32 %s2836_s12, 8 }
  0xfc   : > { %2274 = vmatpush3.bf16.msra.mxu0 %v2271_v15  ;;  %v800_v3 = vld [vmem:[%s522_s29] sm:$0x1]  ;;  %s1777_s11 = scalar_lea.sflag [#allocation4], %s3240_s20  ;;  %s2864_s12 = smov [#allocation14]  }
  0xfd   : > { %2283 = vmatpush3.bf16.msra.mxu1 %v2282_v17  ;;  %2284 = vmatprep.subr.bf16.mxu0 %v2855_v0  ;;  %v2003_v4 = vadd.f32 -1.0, %v800_v3  ;;  %s2746_s6 = sshll.u32 %s2864_s12, 4  ;;  %s2747_s6 = int_to_ptr.vmem [resolvable:$false] %s2746_s6 }
  0xfe   : > { %s2748_s16 = scalar_lea.vmem %s2747_s6, 512  ;;  %p2749_p2 = scmp.lt.s32.totalorder %s3453_s23, %s2747_s6 }
  0xff   : > { %2132 = vmatmul.mubr.msk.f32.vlgmr.msra.gmra.mrb[0].mxu0 %vm534_vm1, %v526_v18  ;;  %v802_v6 = vmul.f32 1e+09, %v2003_v4  ;;  %p3584_p12 = scmp.ne.s32.totalorder %s3581_s30, 0 }
 0x100   : > { %2147 = vmatmul.mubr.msk.f32.vlgmr.msra.gmra.mrb[0].mxu1 %vm622_vm2, %v527_v19  ;;  %2167 = vmatprep.mubr.msk.f32.mxu0 %vm2856_vm0, %v2857_v1 }
 0x101   : > { %2149 = vmatprep.mubr.msk.f32.mxu1 %vm2856_vm0, %v2857_v1  ;;  %2286 = vmatpush3.bf16.msra.mxu0 %v2285_v25  ;;  %v3365_v8 = vrot.slane %v802_v6, %v806_v7 }
 0x102   : > { %2287 = vmatprep.subr.bf16.mxu0 %v2855_v0 }
 0x104   : > { %2150 = vmatmul.mubr.msk.f32.gmra.mrb[2].mxu1 %vm622_vm2, %v528_v20 }
 0x105   : > { %2152 = vmatprep.mubr.msk.f32.mxu1 %vm2856_vm0, %v2857_v1  ;;  %2289 = vmatpush3.bf16.msra.mxu0 %v2288_v27 }
 0x106   : > { %2290 = vmatprep.subr.bf16.mxu0 %v2855_v0 }
 0x108   : > { %2153 = vmatmul.mubr.msk.f32.gmra.mrb[4].mxu1 %vm622_vm2, %v529_v21 }
 0x109   : > { %2292 = vmatpush3.bf16.msra.mxu0 %v2291_v30  ;;  %v2026_v30 = vld [vmem:[%s3271_s25 + $0x28] sm:$0xff] }
 0x10c   : > { %2168 = vmatmul.mubr.msk.f32.vlgmr.msra.gmra.mrb[2].mxu0 %vm622_vm2, %v527_v19 }
 0x10d   : > { %2170 = vmatprep.mubr.msk.f32.mxu0 %vm2856_vm0, %v2857_v1 }
 0x110   : > { %2171 = vmatmul.mubr.msk.f32.gmra.mrb[4].mxu0 %vm622_vm2, %v528_v20 }
 0x111   : > { %2173 = vmatprep.mubr.msk.f32.mxu0 %vm2856_vm0, %v2857_v1 }
 0x114   : > { %2174 = vmatmul.mubr.msk.f32.gmra.mrb[6].mxu0 %vm622_vm2, %v529_v21  ;;  %v2016_v21 = vld [vmem:[%s3271_s25 + $0x10] sm:$0xff] }
 0x1d2   : > { %v2133_v31 = vpop.f32.mrb[0].mxu0 }
 0x1d3   : > { %v698_v32 = vpop.f32.mrb[0].mxu1  ;;  %v607_v33 = vpop.f32.mrb[1].mxu0  ;;  %v3320_v43 = vmul.f32 0.25, %v2133_v31 }
 0x1d4   : > { %v2148_v34 = vpop.f32.mrb[1].mxu1  ;;  %v3296_v35 = vmul.f32 0.25, %v607_v33  ;;  %v2025_v33 = vld [vmem:[%s3271_s25 + $0x20] sm:$0xff] }
 0x1d6   : > { %2182 = vmatprep.mubr.msk.f32.mxu1 %vm809_vm3, %v3296_v35 }
 0x1d7   : > { %v703_v36 = vpop.f32.mrb[2].mxu1 }
 0x1d8   : > { %v2293_v37 = vpack.c.bf16 %v703_v36, %v698_v32  ;;  %v2151_v38 = vpop.f32.mrb[3].mxu1  ;;  %v3300_v39 = vpack.i.bf16 %v703_v36, %v698_v32 }
 0x1da   : > { %2484 = vrot.lane.b32.xlu1 %v3300_v39, %s2858_s15  ;;  %2479 = vrot.lane.b32.xlu0 %v3300_v39, %s2859_s17 }
 0x1db   : > { %2295 = vmatprep.subr.msk.bf16.mxu1 %vm3304_vm4, %v2293_v37  ;;  %v3314_v41 = vpop.f32.mrb[4].mxu1 }
 0x1dc   : > { %2298 = vmatpush3.bf16.xpose.msk.msra.mxu1 %vm3304_vm4, %v2293_v37  ;;  %v2154_v42 = vpop.f32.mrb[5].mxu1 }
 0x1dd   : > { %2180 = vmatprep.subr.msk.mxu1 %vm809_vm3, %v3314_v41 }
 0x1de   : > { %1008 = vrot.lane.b32.xlu1 %v3296_v35, %s2859_s17  ;;  %1016 = vrot.lane.b32.xlu0 %v3314_v41, %s2859_s17 }
 0x1df   : > { %v784_v44 = vpop.f32.mrb[2].mxu0 }
 0x1e0   : > { %v2169_v45 = vpop.f32.mrb[3].mxu0 }
 0x1e2   : > { %1231 = vrot.lane.b32.xlu1 %v3314_v41, %s2858_s15  ;;  %1010 = vrot.lane.b32.xlu0 %v3320_v43, %s2859_s17 }
 0x1e3   : > { %v789_v50 = vpop.f32.mrb[4].mxu0 }
 0x1e4   : > { %2181 = vmatpush3.xpose.msk.msra.mxu1 %vm809_vm3, %v3314_v41  ;;  %v3338_v51 = vpack.i.bf16 %v789_v50, %v784_v44  ;;  %v2172_v52 = vpop.f32.mrb[5].mxu0  ;;  %v2299_v56 = vpack.c.bf16 %v789_v50, %v784_v44 }
 0x1e6   : > { %1223 = vrot.lane.b32.xlu0 %v3296_v35, %s2858_s15  ;;  %1225 = vrot.lane.b32.xlu1 %v3320_v43, %s2858_s15 }
 0x1e7   : > { %2183 = vmatmul.mubr.msk.f32.vlgmr.msra.gmra.mrb[6].mxu1 %vm809_vm3, %v3320_v43  ;;  %v3343_v57 = vpop.f32.mrb[6].mxu0  ;;  %2300 = vmatprep.subr.bf16.mxu1 %v2299_v56 }
 0x1e8   : > { %v2175_v58 = vpop.f32.mrb[7].mxu0  ;;  %2302 = vmatpush3.bf16.msra.mxu1 %v2299_v56 }
 0x1e9   : > { %2189 = vmatprep.subr.mxu1 %v3343_v57 }
 0x1ec   : > { %2190 = vmatpush3.msra.mxu1 %v3343_v57 }
 0x24c   : > { %v2485_v46 = vpop.permute.xlu1 %2484  ;;  %v2480_v47 = vpop.permute.xlu0 %2479 }
 0x24d   : > { %v2482_v48 = vunpack.i.h.bf16 %v2480_v47  ;;  %v2481_v49 = vunpack.i.l.bf16 %v2480_v47  ;;  %v2487_v59 = vunpack.i.h.bf16 %v2485_v46  ;;  %v2486_v60 = vunpack.i.l.bf16 %v2485_v46 }
 0x24f   : > { %v2303_v53 = vpack.c.bf16 %v2482_v48, %v2481_v49  ;;  %v2313_v62 = vpack.c.bf16 %v2487_v59, %v2486_v60 }
 0x250   : > { %v1009_v54 = vpop.permute.xlu1 %1008  ;;  %v1017_v55 = vpop.permute.xlu0 %1016 }
 0x251   : > { %2305 = vmatprep.subr.msk.bf16.mxu0 %vm3304_vm4, %v2303_v53  ;;  %2200 = vmatprep.mubr.msk.f32.mxu0 %vm809_vm3, %v1009_v54 }
 0x252   : > { %2308 = vmatpush3.bf16.xpose.msk.msra.mxu0 %vm3304_vm4, %v2303_v53 }
 0x253   : > { %2198 = vmatprep.subr.msk.mxu0 %vm809_vm3, %v1017_v55 }
 0x254   : > { %v1011_v61 = vpop.permute.xlu0 %1010  ;;  %v1232_v0 = vpop.permute.xlu1 %1231 }
 0x258   : > { %v1224_v63 = vpop.permute.xlu0 %1223  ;;  %v1226_v1 = vpop.permute.xlu1 %1225 }
 0x25a   : > { %2199 = vmatpush3.xpose.msk.msra.mxu0 %vm809_vm3, %v1017_v55 }
 0x25b   : > { %2315 = vmatprep.subr.msk.bf16.mxu0 %vm3304_vm4, %v2313_v62 }
 0x25d   : > { %2201 = vmatmul.mubr.msk.f32.vlgmr.msra.gmra.mrb[8].mxu0 %vm809_vm3, %v1011_v61 }
 0x25e   : > { %2318 = vmatpush3.bf16.xpose.msk.msra.mxu0 %vm3304_vm4, %v2313_v62  ;;  %2218 = vmatprep.mubr.msk.f32.mxu0 %vm809_vm3, %v1224_v63 }
 0x25f   : > { %2216 = vmatprep.subr.msk.mxu0 %vm809_vm3, %v1232_v0 }
 0x266   : > { %2217 = vmatpush3.xpose.msk.msra.mxu0 %vm809_vm3, %v1232_v0 }
 0x269   : > { %2219 = vmatmul.mubr.msk.f32.vlgmr.msra.gmra.mrb[10].mxu0 %vm809_vm3, %v1226_v1 }
 0x2ba   : > { %v2184_v9 = vpop.f32.mrb[6].mxu1 }
 0x2bb   : > { %v897_v11 = vadd.f32 %v2184_v9, %v3365_v8  ;;  %v891_v12 = vpop.f32.mrb[7].mxu1 }
 0x2bc   : > { %v892_v14 = vadd.f32 %v891_v12, %v3365_v8 }
 0x2bd   : > { %v903_v15 = vadd.f32 %v901_v10, %v897_v11 }
 0x2be   : > { %v902_v16 = vadd.f32 %v900_v13, %v892_v14 }
 0x2bf   : > { %v908_v17 = vsel %vm904_vm5, %v903_v15, -inf }
 0x2c0   : > { %909 = vmax.xlane.f32.xlu1 %v908_v17  ;;  %v905_v18 = vsel %vm904_vm5, %v902_v16, -inf }
 0x2c1   : > { %906 = vmax.xlane.f32.xlu0 %v905_v18 }
 0x2d1   : > { %2489 = vrot.lane.b32.xlu1 %v3338_v51, %s2859_s17 }
 0x330   : > { %v2202_v19 = vpop.f32.mrb[8].mxu0 }
 0x331   : > { %v1094_v20 = vpop.f32.mrb[9].mxu0  ;;  %v1100_v22 = vadd.f32 %v2202_v19, %v3365_v8 }
 0x332   : > { %v1095_v23 = vadd.f32 %v1094_v20, %v3365_v8 }
 0x333   : > { %v1107_v27 = vadd.f32 %v2017_v24, %v1100_v22 }
 0x334   : > { %v1106_v25 = vadd.f32 %v2016_v21, %v1095_v23 }
 0x335   : > { %v1111_v28 = vsel %vm904_vm5, %v1107_v27, -inf }
 0x336   : > { %v1108_v26 = vsel %vm904_vm5, %v1106_v25, -inf }
 0x337   : > { %1109 = vmax.xlane.f32.xlu0 %v1108_v26 }
 0x33b   : > { %1112 = vmax.xlane.f32.xlu0 %v1111_v28 }
 0x33c   : > { %v2220_v29 = vpop.f32.mrb[10].mxu0 }
 0x33d   : > { %v1315_v31 = vadd.f32 %v2220_v29, %v3365_v8  ;;  %v1309_v32 = vpop.f32.mrb[11].mxu0 }
 0x33e   : > { %v1310_v34 = vadd.f32 %v1309_v32, %v3365_v8 }
 0x33f   : > { %v1322_v36 = vadd.f32 %v2026_v30, %v1315_v31 }
 0x340   : > { %v1321_v37 = vadd.f32 %v2025_v33, %v1310_v34 }
 0x341   : > { %v1326_v38 = vsel %vm904_vm5, %v1322_v36, -inf }
 0x342   : > { %1327 = vmax.xlane.f32.xlu0 %v1326_v38  ;;  %v1323_v42 = vsel %vm904_vm5, %v1321_v37, -inf }
 0x343   : > { %1324 = vmax.xlane.f32.xlu1 %v1323_v42 }
 0x34d   : > { %v910_v44 = vpop.xlane.xlu1 %909 }
 0x34e   : > { %v912_v45 = vsub.f32 %v903_v15, %v910_v44  ;;  %v907_v54 = vpop.xlane.xlu0 %906 }
 0x34f   : > { %v911_v55 = vsub.f32 %v902_v16, %v907_v54 }
 0x350   : > { %v915_v46 = vmul.f32 1.442695, %v912_v45 }
 0x351   : > { %v2490_v47 = vpop.permute.xlu1 %2489  ;;  %v913_v56 = vmul.f32 1.442695, %v911_v55 }
 0x352   : > { %2508 = vpow2.f32 %v915_v46  ;;  %v2492_v48 = vunpack.i.h.bf16 %v2490_v47  ;;  %v2491_v49 = vunpack.i.l.bf16 %v2490_v47 }
 0x353   : > { %2510 = vpow2.f32 %v913_v56  ;;  %v2035_v56 = vld [vmem:[%s3271_s25 + $0x38] sm:$0xff] }
 0x354   : > { %2494 = vrot.lane.b32.xlu1 %v3338_v51, %s2858_s15  ;;  %v2309_v50 = vpack.c.bf16 %v2492_v48, %v2491_v49 }
 0x356   : > { %2310 = vmatprep.subr.bf16.mxu1 %v2309_v50 }
 0x35c   : > { %v2509_v52 = vpop.eup %2508 }
 0x35d   : > { %v920_v53 = vsel %vm904_vm5, %v2509_v52, 0.0  ;;  %v2511_v58 = vpop.eup %2510 }
 0x35e   : > { %921 = vadd.xlane.f32.xlu0 %v920_v53  ;;  %v917_v59 = vsel %vm904_vm5, %v2511_v58, 0.0 }
 0x374   : > { %1137 = vrot.lane.b32.xlu0 %v3343_v57, %s2859_s17  ;;  %s2742_s17 = scalar_lea.vmem %s3453_s23, 256 }
 0x375   : > { %p2743_p13 = scmp.ne.s32.totalorder %s3453_s23, %s2742_s17  ;;  %p2750_p6 = scmp.lt.s32.totalorder %s2748_s16, %s2742_s17 }
 0x377   : > { %p2744_p3 = pnand %p2743_p13, %p3584_p12  ;;  %p2751_p9 = por %p2750_p6, %p2749_p2 }
 0x378   : > { %918 = vadd.xlane.f32.xlu1 %v917_v59 }
 0x379   : > { %p2745_p0 = pneg %p2744_p3 }
 0x37b   : > { %p2752_p1 = pnand %p2751_p9, %p2745_p0 }
 0x3c4   : > { %v1110_v60 = vpop.xlane.xlu0 %1109 }
 0x3c5   : > { %v1114_v61 = vsub.f32 %v1106_v25, %v1110_v60  ;;  %v2034_v60 = vld [vmem:[%s3271_s25 + $0x30] sm:$0xff]  ;;  %s3583_s25 = sld [smem:[#allocation33_spill]] }
 0x3c7   : > { %v1116_v62 = vmul.f32 1.442695, %v1114_v61 }
 0x3c8   : > { %v1113_v63 = vpop.xlane.xlu0 %1112 }
 0x3c9   : > { %2512 = vpow2.f32 %v1116_v62  ;;  %v1115_v0 = vsub.f32 %v1107_v27, %v1113_v63 }
 0x3cb   : > { %v1118_v1 = vmul.f32 1.442695, %v1115_v0 }
 0x3cd   : > { %2514 = vpow2.f32 %v1118_v1 }
 0x3cf   : > { %v1328_v2 = vpop.xlane.xlu0 %1327 }
 0x3d0   : > { %v1330_v3 = vsub.f32 %v1322_v36, %v1328_v2  ;;  %v1325_v12 = vpop.xlane.xlu1 %1324 }
 0x3d1   : > { %v1329_v13 = vsub.f32 %v1321_v37, %v1325_v12 }
 0x3d2   : > { %v1333_v4 = vmul.f32 1.442695, %v1330_v3 }
 0x3d3   : > { %v2513_v5 = vpop.eup %2512  ;;  %v1331_v14 = vmul.f32 1.442695, %v1329_v13 }
 0x3d4   : > { %2516 = vpow2.f32 %v1333_v4  ;;  %v1120_v6 = vsel %vm904_vm5, %v2513_v5, 0.0  ;;  %v2495_v15 = vpop.permute.xlu1 %2494 }
 0x3d5   : > { %1121 = vadd.xlane.f32.xlu1 %v1120_v6  ;;  %2518 = vpow2.f32 %v1331_v14  ;;  %v2496_v24 = vunpack.i.l.bf16 %v2495_v15 }
 0x3d7   : > { %v2515_v7 = vpop.eup %2514 }
 0x3d8   : > { %v1123_v9 = vsel %vm904_vm5, %v2515_v7, 0.0 }
 0x3d9   : > { %1124 = vadd.xlane.f32.xlu0 %v1123_v9 }
 0x3de   : > { %v2517_v10 = vpop.eup %2516 }
 0x3df   : > { %v1338_v11 = vsel %vm904_vm5, %v2517_v10, 0.0  ;;  %v2519_v18 = vpop.eup %2518 }
 0x3e0   : > { %1339 = vadd.xlane.f32.xlu0 %v1338_v11  ;;  %v1335_v19 = vsel %vm904_vm5, %v2519_v18, 0.0 }
 0x3e6   : > { %1349 = vrot.lane.b32.xlu1 %v3343_v57, %s2858_s15  ;;  %s3458_s15 = scalar_lea.hbm %s3583_s25, %s2048_s19 }
 0x3eb   : > { %v922_v16 = vpop.xlane.xlu0 %921 }
 0x3ec   : > { %2520 = vrcp.f32 %v922_v16 }
 0x3f6   : > { %2499 = vrot.lane.b32.xlu0 %v3300_v39, %s2860_s26  ;;  %v2521_v20 = vpop.eup %2520  ;;  %v2497_v39 = vunpack.i.h.bf16 %v2495_v15 }
 0x3f7   : > { %v926_v23 = vmul.f32 %v2521_v20, %v2509_v52 }
 0x3f8   : > { %v2319_v25 = vpack.c.bf16 %v2497_v39, %v2496_v24  ;;  %v1679_v39 = vld [vmem:[#allocation11 + $0x10] sm:$0xff]  ;;  %v1680_v24 = vld [vmem:[#allocation11 + $0x18] sm:$0xff] }
 0x3fa   : > { %1435 = vrot.lane.b32.xlu0 %v3296_v35, %s2860_s26  ;;  %v1138_v35 = vpop.permute.xlu0 %1137 }
 0x405   : > { %v919_v17 = vpop.xlane.xlu1 %918 }
 0x406   : > { %2522 = vrcp.f32 %v919_v17 }
 0x40a   : > { %1336 = vadd.xlane.f32.xlu1 %v1335_v19 }
 0x410   : > { %v2523_v21 = vpop.eup %2522 }
 0x411   : > { %v925_v22 = vmul.f32 %v2523_v21, %v2511_v58 }
 0x413   : > { %2191 = vmatprep.mubr.msk.f32.mxu1 %vm904_vm5, %v925_v22  ;;  %v1677_v22 = vld [vmem:[#allocation11] sm:$0xff] }
 0x414   : > { %2192 = vmatmul.mubr.msk.f32.vlgmr.msra.gmra.mrb[8].mxu1 %vm904_vm5, %v926_v23  ;;  %v1678_v23 = vld [vmem:[#allocation11 + $0x8] sm:$0xff] }
 0x415   : > { %2312 = vmatpush3.bf16.msra.mxu1 %v2309_v50 }
 0x416   : > { %2207 = vmatprep.subr.mxu1 %v1138_v35 }
 0x419   : > { %2208 = vmatpush3.msra.mxu1 %v1138_v35  ;;  %v2337_v35 = vpack.c.bf16 %v1680_v24, %v1679_v39 }
 0x41a   : > { %2320 = vmatprep.subr.bf16.mxu1 %v2319_v25 }
 0x41b   : > { %1443 = vrot.lane.b32.xlu1 %v3314_v41, %s2860_s26 }
 0x41f   : > { %1437 = vrot.lane.b32.xlu1 %v3320_v43, %s2860_s26 }
 0x462   : > { %v1122_v26 = vpop.xlane.xlu1 %1121 }
 0x463   : > { %2524 = vrcp.f32 %v1122_v26  ;;  %v1682_v26 = vld [vmem:[#allocation11 + $0x28] sm:$0xff] }
 0x466   : > { %v1125_v27 = vpop.xlane.xlu0 %1124  ;;  %v1350_v41 = vpop.permute.xlu1 %1349 }
 0x467   : > { %2526 = vrcp.f32 %v1125_v27 }
 0x46d   : > { %v2525_v28 = vpop.eup %2524  ;;  %v1340_v29 = vpop.xlane.xlu0 %1339 }
 0x46e   : > { %v1128_v30 = vmul.f32 %v2525_v28, %v2513_v5  ;;  %2528 = vrcp.f32 %v1340_v29  ;;  %v1683_v28 = vld [vmem:[#allocation11 + $0x30] sm:$0xff]  ;;  %v1684_v29 = vld [vmem:[#allocation11 + $0x38] sm:$0xff] }
 0x470   : > { %2209 = vmatprep.mubr.msk.f32.mxu1 %vm904_vm5, %v1128_v30  ;;  %v2345_v30 = vpack.c.bf16 %v1684_v29, %v1683_v28 }
 0x471   : > { %v2527_v31 = vpop.eup %2526  ;;  %v2500_v32 = vpop.permute.xlu0 %2499 }
 0x472   : > { %v1129_v33 = vmul.f32 %v2527_v31, %v2515_v7  ;;  %v2502_v34 = vunpack.i.h.bf16 %v2500_v32  ;;  %v2501_v36 = vunpack.i.l.bf16 %v2500_v32 }
 0x474   : > { %2210 = vmatmul.mubr.msk.f32.vlgmr.msra.gmra.mrb[10].mxu1 %vm904_vm5, %v1129_v33  ;;  %v2323_v43 = vpack.c.bf16 %v2502_v34, %v2501_v36 }
 0x475   : > { %2322 = vmatpush3.bf16.msra.mxu1 %v2319_v25  ;;  %v1436_v46 = vpop.permute.xlu0 %1435  ;;  %v1681_v25 = vld [vmem:[#allocation11 + $0x20] sm:$0xff] }
 0x476   : > { %2225 = vmatprep.subr.mxu1 %v1350_v41  ;;  %v2341_v27 = vpack.c.bf16 %v1682_v26, %v1681_v25 }
 0x478   : > { %v2529_v38 = vpop.eup %2528 }
 0x479   : > { %2226 = vmatpush3.msra.mxu1 %v1350_v41  ;;  %v1344_v45 = vmul.f32 %v2529_v38, %v2517_v10 }
 0x47a   : > { %2325 = vmatprep.subr.msk.bf16.mxu1 %vm3304_vm4, %v2323_v43 }
 0x497   : > { %v1337_v37 = vpop.xlane.xlu1 %1336 }
 0x498   : > { %2530 = vrcp.f32 %v1337_v37 }
 0x49b   : > { %v1444_v47 = vpop.permute.xlu1 %1443 }
 0x49f   : > { %v1438_v48 = vpop.permute.xlu1 %1437 }
 0x4a2   : > { %v2531_v42 = vpop.eup %2530 }
 0x4a3   : > { %v1343_v44 = vmul.f32 %v2531_v42, %v2519_v18 }
 0x4a5   : > { %2227 = vmatprep.mubr.msk.f32.mxu1 %vm904_vm5, %v1343_v44 }
 0x4a6   : > { %2228 = vmatmul.mubr.msk.f32.vlgmr.msra.gmra.mrb[12].mxu1 %vm904_vm5, %v1344_v45 }
 0x4a7   : > { %2328 = vmatpush3.bf16.xpose.msk.msra.mxu1 %vm3304_vm4, %v2323_v43  ;;  %2236 = vmatprep.mubr.msk.f32.mxu1 %vm809_vm3, %v1436_v46 }
 0x4a8   : > { %2234 = vmatprep.subr.msk.mxu1 %vm809_vm3, %v1444_v47 }
 0x4af   : > { %2235 = vmatpush3.xpose.msk.msra.mxu1 %vm809_vm3, %v1444_v47 }
 0x4b2   : > { %2237 = vmatmul.mubr.msk.f32.vlgmr.msra.gmra.mrb[14].mxu1 %vm809_vm3, %v1438_v48  ;;  %v2038_v48 = vld [vmem:[%s3582_s2] ss:$0 sm:$0xff] }
 0x4e7   : > { %v3421_v49 = vpop.f32.mrb[8].mxu1 }
 0x4e8   : > { %v3423_v50 = vpop.f32.mrb[9].mxu1 }
 0x547   : > { %v2211_v52 = vpop.f32.mrb[10].mxu1 }
 0x548   : > { %v1214_v53 = vpop.f32.mrb[11].mxu1 }
 0x579   : > { %v2229_v54 = vpop.f32.mrb[12].mxu1 }
 0x57a   : > { %v1426_v55 = vpop.f32.mrb[13].mxu1 }
 0x585   : > { %v2238_v40 = vpop.f32.mrb[14].mxu1 }
 0x586   : > { %v1527_v58 = vadd.f32 %v2238_v40, %v3365_v8  ;;  %v1521_v59 = vpop.f32.mrb[15].mxu1 }
 0x587   : > { %v1522_v61 = vadd.f32 %v1521_v59, %v3365_v8 }
 0x588   : > { %v1534_v62 = vadd.f32 %v2035_v56, %v1527_v58 }
 0x589   : > { %v1533_v63 = vadd.f32 %v2034_v60, %v1522_v61 }
 0x58a   : > { %v1538_v0 = vsel %vm904_vm5, %v1534_v62, -inf }
 0x58b   : > { %1539 = vmax.xlane.f32.xlu1 %v1538_v0  ;;  %v1535_v1 = vsel %vm904_vm5, %v1533_v63, -inf }
 0x58c   : > { %1536 = vmax.xlane.f32.xlu0 %v1535_v1 }
 0x59c   : > { %2504 = vrot.lane.b32.xlu1 %v3338_v51, %s2860_s26 }
 0x5a0   : > { %1649 = vrot.lane.b32.xlu1 %v1214_v53, %s2861_s0 }
 0x5a4   : > { %1651 = vrot.lane.b32.xlu1 %v2211_v52, %s2861_s0 }
 0x5a8   : > { %1659 = vrot.lane.b32.xlu1 %v2229_v54, %s2862_s24 }
 0x618   : > { %v1540_v2 = vpop.xlane.xlu1 %1539 }
 0x619   : > { %v1542_v3 = vsub.f32 %v1534_v62, %v1540_v2  ;;  %v1537_v4 = vpop.xlane.xlu0 %1536 }
 0x61a   : > { %v1541_v8 = vsub.f32 %v1533_v63, %v1537_v4 }
 0x61b   : > { %v1545_v5 = vmul.f32 1.442695, %v1542_v3 }
 0x61c   : > { %v1543_v6 = vmul.f32 1.442695, %v1541_v8  ;;  %v2505_v7 = vpop.permute.xlu1 %2504 }
 0x61d   : > { %2532 = vpow2.f32 %v1545_v5  ;;  %v2507_v9 = vunpack.i.h.bf16 %v2505_v7  ;;  %v2506_v10 = vunpack.i.l.bf16 %v2505_v7 }
 0x61e   : > { %2534 = vpow2.f32 %v1543_v6 }
 0x61f   : > { %v2329_v11 = vpack.c.bf16 %v2507_v9, %v2506_v10 }
 0x620   : > { %v1650_v33 = vpop.permute.xlu1 %1649 }
 0x621   : > { %2330 = vmatprep.subr.bf16.mxu1 %v2329_v11  ;;  %v1671_v43 = vsel %vm809_vm3, %v3423_v50, %v1650_v33 }
 0x622   : > { %2332 = vmatpush3.bf16.msra.mxu1 %v2329_v11 }
 0x624   : > { %v1652_v34 = vpop.permute.xlu1 %1651 }
 0x625   : > { %v1672_v38 = vsel %vm809_vm3, %v3421_v49, %v1652_v34 }
 0x627   : > { %v2533_v51 = vpop.eup %2532 }
 0x628   : > { %v1550_v12 = vsel %vm904_vm5, %v2533_v51, 0.0  ;;  %v2535_v13 = vpop.eup %2534  ;;  %v1660_v36 = vpop.permute.xlu1 %1659 }
 0x629   : > { %1551 = vadd.xlane.f32.xlu0 %v1550_v12  ;;  %v1547_v14 = vsel %vm904_vm5, %v2535_v13, 0.0  ;;  %v1674_v45 = vsel %vm534_vm1, %v1672_v38, %v1660_v36 }
 0x62d   : > { %1548 = vadd.xlane.f32.xlu0 %v1547_v14 }
 0x643   : > { %1561 = vrot.lane.b32.xlu0 %v3343_v57, %s2860_s26  ;;  %v2333_v57 = vpack.c.bf16 %v1678_v23, %v1677_v22 }
 0x645   : > { %2334 = vmatprep.subr.bf16.mxu0 %v2333_v57 }
 0x646   : > { %2336 = vmatpush3.bf16.msra.mxu0 %v2333_v57 }
 0x647   : > { %1657 = vrot.lane.b32.xlu0 %v1426_v55, %s2862_s24  ;;  %2338 = vmatprep.subr.bf16.mxu0 %v2337_v35 }
 0x64a   : > { %2340 = vmatpush3.bf16.msra.mxu0 %v2337_v35 }
 0x64b   : > { %2342 = vmatprep.subr.bf16.mxu0 %v2341_v27 }
 0x64e   : > { %2344 = vmatpush3.bf16.msra.mxu0 %v2341_v27 }
 0x64f   : > { %2346 = vmatprep.subr.bf16.mxu0 %v2345_v30 }
 0x652   : > { %2348 = vmatpush3.bf16.msra.mxu0 %v2345_v30 }
 0x6b6   : > { %v1552_v15 = vpop.xlane.xlu0 %1551 }
 0x6b7   : > { %2536 = vrcp.f32 %v1552_v15 }
 0x6ba   : > { %v1549_v16 = vpop.xlane.xlu0 %1548 }
 0x6bb   : > { %2538 = vrcp.f32 %v1549_v16 }
 0x6be   : > { %v1562_v17 = vpop.permute.xlu0 %1561 }
 0x6bf   : > { %2243 = vmatprep.subr.mxu1 %v1562_v17 }
 0x6c0   : > { %2244 = vmatpush3.msra.mxu1 %v1562_v17 }
 0x6c1   : > { %v2537_v18 = vpop.eup %2536 }
 0x6c2   : > { %v1556_v21 = vmul.f32 %v2537_v18, %v2533_v51  ;;  %v1658_v41 = vpop.permute.xlu0 %1657 }
 0x6c3   : > { %v1673_v42 = vsel %vm534_vm1, %v1671_v43, %v1658_v41 }
 0x6c5   : > { %v2539_v19 = vpop.eup %2538 }
 0x6c6   : > { %v1555_v20 = vmul.f32 %v2539_v19, %v2535_v13 }
 0x6c8   : > { %2245 = vmatprep.mubr.msk.f32.mxu1 %vm904_vm5, %v1555_v20 }
 0x6c9   : > { %2246 = vmatmul.mubr.msk.f32.vlgmr.msra.gmra.mrb[16].mxu1 %vm904_vm5, %v1556_v21 }
 0x79c   : > { %v2247_v31 = vpop.f32.mrb[16].mxu1 }
 0x79d   : > { %1667 = vrot.lane.b32.xlu1 %v2247_v31, %s2863_s18  ;;  %v1638_v32 = vpop.f32.mrb[17].mxu1 }
 0x79e   : > { %1665 = vrot.lane.b32.xlu0 %v1638_v32, %s2863_s18 }
 0x80f   : > { %v1668_v37 = vpop.permute.xlu1 %1667 }
 0x810   : > { %v1666_v44 = vpop.permute.xlu0 %1665  ;;  %v1676_v47 = vsel %vm622_vm2, %v1674_v45, %v1668_v37 }
 0x811   : > { %v1675_v46 = vsel %vm622_vm2, %v1673_v42, %v1666_v44 }
 0x812   : > { %2264 = vmatprep.mubr.msk.f32.mxu0 %vm1692_vm6, %v1675_v46 }
 0x813   : > { %2265 = vmatmul.mubr.msk.f32.vlgmr.msra.gmra.mrb[12].mxu0 %vm1692_vm6, %v1676_v47 }
 0x8e6   : > { %v2266_v49 = vpop.f32.mrb[12].mxu0 }
 0x8e7   : > { %v1771_v50 = vadd.f32 %v2266_v49, %v2038_v48  ;;  %v1765_v52 = vpop.f32.mrb[13].mxu0 }
 0x8e8   : > { %v1766_v53 = vadd.f32 %v2038_v48, %v1765_v52 }
 0x8e9   : > { %1775 = vst [vmem:[%s518_s7 + $0x8] sm:$0xff] %v1771_v50 }
 0x8ea   : > { %1774 = vst [vmem:[%s518_s7] sm:$0xff] %v1766_v53 }
 0x8eb   : > { %2755 = shalt.err (!%p2752_p1)
}
 0x8ec   : > { %s2756_s22 = scalar_lea.hbm %s3458_s15, 256  ;;  %s2760_s26 = scalar_lea.hbm %s3583_s25, 512 }
 0x8ed   : > { %p2757_p10 = scmp.ne.s32.totalorder %s3458_s15, %s2756_s22  ;;  %p2761_p11 = scmp.lt.u32.totalorder %s3458_s15, %s3583_s25 }
 0x8ee   : > { %p2762_p8 = scmp.lt.u32.totalorder %s2760_s26, %s2756_s22  ;;  %p2764_p13 = scmp.lt.u32.totalorder %s2756_s22, %s3458_s15 }
 0x8ef   : > { %p2758_p5 = pnand %p2757_p10, %p3584_p12 }
 0x8f0   : > { %p2763_p4 = por %p2762_p8, %p2761_p11 }
 0x8f1   : > { %p2759_p7 = pneg %p2758_p5 }
 0x8f2   : > { %p2765_p3 = por %p2764_p13, %p2763_p4 }
 0x8f4   : > { %p2766_p0 = pnand %p2765_p3, %p2759_p7 }
 0x8f6   : > { %2769 = shalt.err (!%p2766_p0)
}
 0x8f7   : > { %s2865_s18 = smov 128   ;;  %s2866_s7 = smov 8  }
 0x8f8   : > { %2374 = dma.vmem_to_hbm [thread:$0]  (%p3584_p12), %s3453_s23, 256, %s3458_s15, %s1777_s11, %s2865_s18, %s2865_s18, %s2866_s7  }
 0x8f9 PF: > { %s3585_s27 = sld [smem:[#allocation22_spill]]  ;;  %s3586_s28 = sld [smem:[#allocation24_spill]] }
 0x8fa   : > { %p3588_p6 = scmp.ge.s32.totalorder %s2844_s14, 2 }
 0x8ff   : > { %s1807_s2 = sand.u32 1, %s3585_s27   ;;  %p3587_p2 = scmp.ne.s32.totalorder %s3586_s28, 0 }
 0x900   : > { %s1808_s19 = scalar_lea.sflag [#allocation4], %s1807_s2 }
 0x901   : > { %p2400_p9 = pnand %p3588_p6, %p3587_p2 }
 0x903   : > { %2819 = dma.done.wait (!%p2400_p9), %s1808_s19, 256  }
 0x904   : > { %2821 = vsyncadd (!%p2400_p9), %s1808_s19, 4294967040  ;;  %s30_s14 = sadd.s32 1, %s2844_s14   ;;  %s3589_s3 = sld [smem:[#allocation23_spill]] }
 0x905   : > { %p27_p1 = scmp.ge.s32.totalorder %s30_s14, 4   ;;  %s3590_s11 = sld [smem:[#allocation27_spill]] }
 0x906   : > { %s3591_s20 = sld [smem:[#allocation25_spill]]  ;;  %s3592_s30 = smov %s2828_s10 }
 0x907   : > { %s3594_s12 = smov %s2840_s13  ;;  %29 = sbr.rel (!%p27_p1) target bundleno = 17 (0x11), region = 147 }
 0x90a   : > { %s3593_s10 = smov %s3589_s3 }
 0x90c   : > { %s3595_s13 = smov %s3591_s20 }
 0x90e   :  { %1813 = vsyncpa [#allocation3], 1 }
 0x90f   :  { %1815 = vsyncpa [#allocation3 + $0x1], 1 }
 0x910   :  { %1816 = vsyncpa [#allocation6], 1 }
 0x911   :  { %1818 = vsyncpa [#allocation6 + $0x1], 1 }
 0x912   :  { %1819 = vsyncpa [#allocation9], 1 }
 0x913   :  { %1820 = vsyncpa [#allocation12], 1 }
 0x914   :  { %1821 = vsyncpa [#allocation4], 1 }
 0x915   :  { %1823 = vsyncpa [#allocation4 + $0x1], 1 }

</bundles_post_ra>
